<compile_context>
chip_gen: v5e
topology: v5e:2x2
jax: 0.10.0
libtpu: 0.0.40
codegen_flags: <defaults>
</compile_context>

<pallas_src>
import functools

import jax
import jax.numpy as jnp
from jax.experimental import pallas as pl
from jax.experimental.pallas import tpu as pltpu

# ----- module hyper-parameters (from the PyTorch source) -----
N_EMBD = 128          # n_embd
NUM_HEADS = 4
HEAD_SIZE = N_EMBD // NUM_HEADS   # 32


def _mha_kernel(x_ref, wqkv_ref, wproj_ref, bproj_ref, o_ref, *, num_heads, head_size):
    """One grid step == Bb batch elements.

    x_ref     : (Bb, T, C)        (bf16 or f32)
    wqkv_ref  : (C, 3C)           fused [Q|K|V] weights, scale folded into Q
    wproj_ref : (H, hs, C)        output projection, pre-split per head
    bproj_ref : (1, C)            f32 bias
    o_ref     : (Bb, T, C)        f32 output
    """
    Bb, T, C = x_ref.shape
    hs = head_size
    cdt = wqkv_ref.dtype                     # MXU-input dtype

    # ---- fused QKV projection: one lane-dense matmul (Bb*T, C) @ (C, 3C) ----
    x2d = x_ref[...].reshape(Bb * T, C)
    qkv = jnp.dot(x2d, wqkv_ref[...], preferred_element_type=jnp.float32)   # (Bb*T, 3C) f32

    # causal mask (col <= row); diagonal is always unmasked so no all--inf rows
    row = jax.lax.broadcasted_iota(jnp.int32, (T, T), 0)
    col = jax.lax.broadcasted_iota(jnp.int32, (T, T), 1)
    causal = (col <= row)[None, :, :]                                       # (1, T, T)

    acc = jnp.zeros((Bb * T, C), dtype=jnp.float32)

    for h in range(num_heads):                # static, unrolled (num_heads == 4)
        q = qkv[:, h * hs:(h + 1) * hs].reshape(Bb, T, hs).astype(cdt)      # scale pre-folded
        k = qkv[:, C + h * hs:C + (h + 1) * hs].reshape(Bb, T, hs).astype(cdt)
        v = qkv[:, 2 * C + h * hs:2 * C + (h + 1) * hs].reshape(Bb, T, hs).astype(cdt)

        # batched attention over the Bb block
        s = jnp.einsum('bqd,bkd->bqk', q, k,
                       preferred_element_type=jnp.float32)                  # (Bb, T, T) f32
        s = jnp.where(causal, s, -jnp.inf)

        # softmax along last axis (f32)
        m = jnp.max(s, axis=-1, keepdims=True)
        p = jnp.exp(s - m)
        denom = jnp.sum(p, axis=-1, keepdims=True)
        probs = (p * pl.reciprocal(denom, approx=True)).astype(cdt)

        head_out = jnp.einsum('bqk,bkd->bqd', probs, v,
                              preferred_element_type=jnp.float32)           # (Bb, T, hs) f32

        # accumulate output projection per head: (Bb*T, hs) @ (hs, C)
        acc = acc + jnp.dot(head_out.reshape(Bb * T, hs).astype(cdt), wproj_ref[h],
                            preferred_element_type=jnp.float32)

    out = acc + bproj_ref[...]                                              # + (1, C) bias
    o_ref[...] = out.reshape(Bb, T, C).astype(o_ref.dtype)


def multi_headed_attention(x, wq, wk, wv, wproj, bproj, *, block_b=None,
                           mxu_dtype=jnp.bfloat16):
    """x: (B, T, C) f32.  wq/wk/wv: (H, C, hs).  wproj: (C, C).  bproj: (1, C).

    Returns (B, T, C) f32.
    """
    B, T, C = x.shape
    H, _, hs = wq.shape
    scale = float(C) ** -0.5          # PyTorch module uses C (= n_embd), not head_size

    # Fused lane-dense QKV weight (C, 3C) = [Q_all | K_all | V_all],
    # head h occupying columns h*hs:(h+1)*hs of its region; scale folded into Q.
    wq_cat = jnp.transpose(wq * scale, (1, 0, 2)).reshape(C, H * hs)
    wk_cat = jnp.transpose(wk, (1, 0, 2)).reshape(C, H * hs)
    wv_cat = jnp.transpose(wv, (1, 0, 2)).reshape(C, H * hs)
    wqkv = jnp.concatenate([wq_cat, wk_cat, wv_cat], axis=1).astype(mxu_dtype)

    # Output projection pre-split per head: (H, hs, C).
    wproj_split = wproj.reshape(H, hs, C).astype(mxu_dtype)
    bproj = bproj.astype(jnp.float32)

    # Multiple batch elements per grid step; keep grid >= 2 for megacore / dual-TC.
    if block_b is None:
        block_b = 1
        for cand in (8, 4, 2):
            if B % cand == 0 and B // cand >= 2:
                block_b = cand
                break
    assert B % block_b == 0, "block_b must divide B"

    kernel = functools.partial(_mha_kernel, num_heads=H, head_size=hs)

    return pl.pallas_call(
        kernel,
        out_shape=jax.ShapeDtypeStruct((B, T, C), jnp.float32),
        grid_spec=pltpu.PrefetchScalarGridSpec(
            num_scalar_prefetch=0,
            grid=(B // block_b,),
            in_specs=[
                pl.BlockSpec((block_b, T, C), lambda b: (b, 0, 0)),   # x block
                pl.BlockSpec((C, 3 * C), lambda b: (0, 0)),           # fused Wqkv
                pl.BlockSpec((H, hs, C), lambda b: (0, 0, 0)),        # Wproj per head
                pl.BlockSpec((1, C), lambda b: (0, 0)),               # bias
            ],
            out_specs=pl.BlockSpec((block_b, T, C), lambda b: (b, 0, 0)),
        ),
        compiler_params=pltpu.CompilerParams(
            dimension_semantics=("parallel",),
        ),
    )(x.astype(mxu_dtype), wqkv, wproj_split, bproj)


def _reference(x, wq, wk, wv, wproj, bproj):
    """Pure-JAX reference mirroring the PyTorch forward (eval mode)."""
    B, T, C = x.shape
    scale = float(C) ** -0.5
    tril = jnp.tril(jnp.ones((T, T), dtype=bool))
    outs = []
    for h in range(wq.shape[0]):
        q = x @ wq[h]
        k = x @ wk[h]
        v = x @ wv[h]
        wei = (q @ jnp.swapaxes(k, -1, -2)) * scale
        wei = jnp.where(tril, wei, -jnp.inf)
        wei = jax.nn.softmax(wei, axis=-1)
        outs.append(wei @ v)
    out = jnp.concatenate(outs, axis=-1)
    return out @ wproj + bproj[0]


if __name__ == "__main__":
    key = jax.random.PRNGKey(0)
    B, T = 8, 16                                     # T <= block_size=256
    C, H, HS = N_EMBD, NUM_HEADS, HEAD_SIZE

    k_x, k_q, k_k, k_v, k_p, k_b = jax.random.split(key, 6)
    x = jax.random.normal(k_x, (B, T, C), dtype=jnp.float32)

    # nn.Linear(n_embd, head_size, bias=False): weight (hs, C); stored transposed (C, hs).
    init = 0.02
    wq = init * jax.random.normal(k_q, (H, C, HS), dtype=jnp.float32)
    wk = init * jax.random.normal(k_k, (H, C, HS), dtype=jnp.float32)
    wv = init * jax.random.normal(k_v, (H, C, HS), dtype=jnp.float32)
    # nn.Linear(n_embd, n_embd): weight (C, C) stored transposed, bias (C,) stored (1, C).
    wproj = init * jax.random.normal(k_p, (C, C), dtype=jnp.float32)
    bproj = init * jax.random.normal(k_b, (1, C), dtype=jnp.float32)

    ref = _reference(x, wq, wk, wv, wproj, bproj)

    # exact-f32 MXU path: tight check
    out_f32 = jax.block_until_ready(
        multi_headed_attention(x, wq, wk, wv, wproj, bproj, mxu_dtype=jnp.float32))
    assert out_f32.shape == (B, T, C)
    assert jnp.allclose(out_f32, ref, atol=2e-3, rtol=2e-3), "f32 path mismatch vs reference"

    # bf16 MXU-input path (default; f32 accumulation + f32 softmax): looser tolerance
    out = jax.block_until_ready(multi_headed_attention(x, wq, wk, wv, wproj, bproj))
    assert out.shape == (B, T, C)
    assert jnp.allclose(out, ref, atol=2e-2, rtol=2e-2), "bf16 path mismatch vs reference"

    print("KERNEL_OK")
</pallas_src>

<mosaic_0001>
module attributes {stable_mosaic.version = 11 : i64} {
  func.func @_mha_kernel(%arg0: i32, %arg1: memref<4x16x128xf32, #tpu.memory_space<vmem>>, %arg2: memref<128x384xf32, #tpu.memory_space<vmem>>, %arg3: memref<4x32x128xf32, #tpu.memory_space<vmem>>, %arg4: memref<1x128xf32, #tpu.memory_space<vmem>>, %arg5: memref<4x16x128xf32, #tpu.memory_space<vmem>>) attributes {dimension_semantics = [#tpu.dimension_semantics<parallel>], iteration_bounds = array<i64: 2>, scalar_prefetch = 0 : i64, scratch_operands = 0 : i64, tpu.core_type = #tpu.core_type<tc>, window_params = [{transform_indices = @transform_0, window_bounds = array<i64: 4, 16, 128>}, {pipeline_mode = #tpu.pipeline_mode<synchronous>, transform_indices = @transform_1, window_bounds = array<i64: 128, 384>}, {pipeline_mode = #tpu.pipeline_mode<synchronous>, transform_indices = @transform_2, window_bounds = array<i64: 4, 32, 128>}, {pipeline_mode = #tpu.pipeline_mode<synchronous>, transform_indices = @transform_3, window_bounds = array<i64: 1, 128>}, {transform_indices = @transform_4, window_bounds = array<i64: 4, 16, 128>}]} {
    %c0 = arith.constant 0 : index
    %c0_0 = arith.constant 0 : index
    %c0_1 = arith.constant 0 : index
    %0 = vector.load %arg1[%c0, %c0_0, %c0_1] : memref<4x16x128xf32, #tpu.memory_space<vmem>>, vector<4x16x128xf32>
    %1 = vector.shape_cast %0 : vector<4x16x128xf32> to vector<64x128xf32>
    %c0_2 = arith.constant 0 : index
    %c0_3 = arith.constant 0 : index
    %2 = vector.load %arg2[%c0_2, %c0_3] : memref<128x384xf32, #tpu.memory_space<vmem>>, vector<128x384xf32>
    %cst = arith.constant dense<0.000000e+00> : vector<64x384xf32>
    %3 = tpu.matmul %1, %2, %cst {dimension_numbers = #tpu.dot_dimension_numbers<[1], [0], [0], [1], [0, 0, 1, 1], [], []>} : vector<64x128xf32>, vector<128x384xf32>, vector<64x384xf32> -> vector<64x384xf32>
    %4 = tpu.iota {dimensions = array<i32: 0>} : vector<16x16xi32>
    %5 = tpu.iota {dimensions = array<i32: 1>} : vector<16x16xi32>
    %6 = arith.cmpi sle, %5, %4 : vector<16x16xi32>
    %7 = vector.shape_cast %6 : vector<16x16xi1> to vector<1x16x16xi1>
    %cst_4 = arith.constant 0.000000e+00 : f32
    %8 = vector.broadcast %cst_4 : f32 to vector<64x128xf32>
    %9 = vector.extract_strided_slice %3 {offsets = [0, 0], sizes = [64, 32], strides = [1, 1]} : vector<64x384xf32> to vector<64x32xf32>
    %10 = vector.shape_cast %9 : vector<64x32xf32> to vector<4x16x32xf32>
    %11 = vector.extract_strided_slice %3 {offsets = [0, 128], sizes = [64, 32], strides = [1, 1]} : vector<64x384xf32> to vector<64x32xf32>
    %12 = vector.shape_cast %11 : vector<64x32xf32> to vector<4x16x32xf32>
    %13 = vector.extract_strided_slice %3 {offsets = [0, 256], sizes = [64, 32], strides = [1, 1]} : vector<64x384xf32> to vector<64x32xf32>
    %14 = vector.shape_cast %13 : vector<64x32xf32> to vector<4x16x32xf32>
    "tpu.trace_start"() <{level = 10 : i32, message = "bqd,bkd->bqk"}> : () -> ()
    %cst_5 = arith.constant dense<0.000000e+00> : vector<4x16x16xf32>
    %15 = tpu.matmul %10, %12, %cst_5 {dimension_numbers = #tpu.dot_dimension_numbers<[2], [2], [1], [1], [0, 0, 0, 1, 1, 1], [0], [0]>} : vector<4x16x32xf32>, vector<4x16x32xf32>, vector<4x16x16xf32> -> vector<4x16x16xf32>
    %cst_6 = arith.constant 0xFF800000 : f32
    "tpu.trace_stop"() : () -> ()
    %16 = vector.shape_cast %7 : vector<1x16x16xi1> to vector<1x16x16xi1>
    %17 = vector.broadcast %16 : vector<1x16x16xi1> to vector<4x16x16xi1>
    %18 = vector.broadcast %cst_6 : f32 to vector<4x16x16xf32>
    %19 = arith.select %17, %15, %18 : vector<4x16x16xi1>, vector<4x16x16xf32>
    %cst_7 = arith.constant dense<0xFF800000> : vector<4x16xf32>
    %20 = vector.multi_reduction <maximumf>, %19, %cst_7 [2] : vector<4x16x16xf32> to vector<4x16xf32>
    %21 = vector.shape_cast %20 : vector<4x16xf32> to vector<4x16x1xf32>
    %22 = vector.broadcast %21 : vector<4x16x1xf32> to vector<4x16x16xf32>
    %23 = arith.subf %19, %22 : vector<4x16x16xf32>
    %24 = math.exp %23 : vector<4x16x16xf32>
    %cst_8 = arith.constant dense<0.000000e+00> : vector<4x16xf32>
    %25 = vector.multi_reduction <add>, %24, %cst_8 [2] : vector<4x16x16xf32> to vector<4x16xf32>
    %26 = vector.shape_cast %25 : vector<4x16xf32> to vector<4x16x1xf32>
    %27 = tpu.reciprocal %26 {approx = true} : vector<4x16x1xf32> -> vector<4x16x1xf32>
    %28 = vector.broadcast %27 : vector<4x16x1xf32> to vector<4x16x16xf32>
    %29 = arith.mulf %24, %28 : vector<4x16x16xf32>
    "tpu.trace_start"() <{level = 10 : i32, message = "bqk,bkd->bqd"}> : () -> ()
    %cst_9 = arith.constant dense<0.000000e+00> : vector<4x16x32xf32>
    %30 = tpu.matmul %29, %14, %cst_9 {dimension_numbers = #tpu.dot_dimension_numbers<[2], [1], [1], [2], [0, 0, 0, 1, 1, 2], [0], [0]>} : vector<4x16x16xf32>, vector<4x16x32xf32>, vector<4x16x32xf32> -> vector<4x16x32xf32>
    "tpu.trace_stop"() : () -> ()
    %31 = vector.shape_cast %30 : vector<4x16x32xf32> to vector<64x32xf32>
    %c0_10 = arith.constant 0 : index
    %c0_11 = arith.constant 0 : index
    %c0_12 = arith.constant 0 : index
    %32 = vector.load %arg3[%c0_10, %c0_11, %c0_12] : memref<4x32x128xf32, #tpu.memory_space<vmem>>, vector<1x32x128xf32>
    %33 = vector.shape_cast %32 : vector<1x32x128xf32> to vector<32x128xf32>
    %cst_13 = arith.constant dense<0.000000e+00> : vector<64x128xf32>
    %34 = tpu.matmul %31, %33, %cst_13 {dimension_numbers = #tpu.dot_dimension_numbers<[1], [0], [0], [1], [0, 0, 1, 1], [], []>} : vector<64x32xf32>, vector<32x128xf32>, vector<64x128xf32> -> vector<64x128xf32>
    %35 = arith.addf %8, %34 : vector<64x128xf32>
    %36 = vector.extract_strided_slice %3 {offsets = [0, 32], sizes = [64, 32], strides = [1, 1]} : vector<64x384xf32> to vector<64x32xf32>
    %37 = vector.shape_cast %36 : vector<64x32xf32> to vector<4x16x32xf32>
    %38 = vector.extract_strided_slice %3 {offsets = [0, 160], sizes = [64, 32], strides = [1, 1]} : vector<64x384xf32> to vector<64x32xf32>
    %39 = vector.shape_cast %38 : vector<64x32xf32> to vector<4x16x32xf32>
    %40 = vector.extract_strided_slice %3 {offsets = [0, 288], sizes = [64, 32], strides = [1, 1]} : vector<64x384xf32> to vector<64x32xf32>
    %41 = vector.shape_cast %40 : vector<64x32xf32> to vector<4x16x32xf32>
    "tpu.trace_start"() <{level = 10 : i32, message = "bqd,bkd->bqk"}> : () -> ()
    %cst_14 = arith.constant dense<0.000000e+00> : vector<4x16x16xf32>
    %42 = tpu.matmul %37, %39, %cst_14 {dimension_numbers = #tpu.dot_dimension_numbers<[2], [2], [1], [1], [0, 0, 0, 1, 1, 1], [0], [0]>} : vector<4x16x32xf32>, vector<4x16x32xf32>, vector<4x16x16xf32> -> vector<4x16x16xf32>
    %cst_15 = arith.constant 0xFF800000 : f32
    "tpu.trace_stop"() : () -> ()
    %43 = vector.shape_cast %7 : vector<1x16x16xi1> to vector<1x16x16xi1>
    %44 = vector.broadcast %43 : vector<1x16x16xi1> to vector<4x16x16xi1>
    %45 = vector.broadcast %cst_15 : f32 to vector<4x16x16xf32>
    %46 = arith.select %44, %42, %45 : vector<4x16x16xi1>, vector<4x16x16xf32>
    %cst_16 = arith.constant dense<0xFF800000> : vector<4x16xf32>
    %47 = vector.multi_reduction <maximumf>, %46, %cst_16 [2] : vector<4x16x16xf32> to vector<4x16xf32>
    %48 = vector.shape_cast %47 : vector<4x16xf32> to vector<4x16x1xf32>
    %49 = vector.broadcast %48 : vector<4x16x1xf32> to vector<4x16x16xf32>
    %50 = arith.subf %46, %49 : vector<4x16x16xf32>
    %51 = math.exp %50 : vector<4x16x16xf32>
    %cst_17 = arith.constant dense<0.000000e+00> : vector<4x16xf32>
    %52 = vector.multi_reduction <add>, %51, %cst_17 [2] : vector<4x16x16xf32> to vector<4x16xf32>
    %53 = vector.shape_cast %52 : vector<4x16xf32> to vector<4x16x1xf32>
    %54 = tpu.reciprocal %53 {approx = true} : vector<4x16x1xf32> -> vector<4x16x1xf32>
    %55 = vector.broadcast %54 : vector<4x16x1xf32> to vector<4x16x16xf32>
    %56 = arith.mulf %51, %55 : vector<4x16x16xf32>
    "tpu.trace_start"() <{level = 10 : i32, message = "bqk,bkd->bqd"}> : () -> ()
    %cst_18 = arith.constant dense<0.000000e+00> : vector<4x16x32xf32>
    %57 = tpu.matmul %56, %41, %cst_18 {dimension_numbers = #tpu.dot_dimension_numbers<[2], [1], [1], [2], [0, 0, 0, 1, 1, 2], [0], [0]>} : vector<4x16x16xf32>, vector<4x16x32xf32>, vector<4x16x32xf32> -> vector<4x16x32xf32>
    "tpu.trace_stop"() : () -> ()
    %58 = vector.shape_cast %57 : vector<4x16x32xf32> to vector<64x32xf32>
    %c1 = arith.constant 1 : index
    %c0_19 = arith.constant 0 : index
    %c0_20 = arith.constant 0 : index
    %59 = vector.load %arg3[%c1, %c0_19, %c0_20] : memref<4x32x128xf32, #tpu.memory_space<vmem>>, vector<1x32x128xf32>
    %60 = vector.shape_cast %59 : vector<1x32x128xf32> to vector<32x128xf32>
    %cst_21 = arith.constant dense<0.000000e+00> : vector<64x128xf32>
    %61 = tpu.matmul %58, %60, %cst_21 {dimension_numbers = #tpu.dot_dimension_numbers<[1], [0], [0], [1], [0, 0, 1, 1], [], []>} : vector<64x32xf32>, vector<32x128xf32>, vector<64x128xf32> -> vector<64x128xf32>
    %62 = arith.addf %35, %61 : vector<64x128xf32>
    %63 = vector.extract_strided_slice %3 {offsets = [0, 64], sizes = [64, 32], strides = [1, 1]} : vector<64x384xf32> to vector<64x32xf32>
    %64 = vector.shape_cast %63 : vector<64x32xf32> to vector<4x16x32xf32>
    %65 = vector.extract_strided_slice %3 {offsets = [0, 192], sizes = [64, 32], strides = [1, 1]} : vector<64x384xf32> to vector<64x32xf32>
    %66 = vector.shape_cast %65 : vector<64x32xf32> to vector<4x16x32xf32>
    %67 = vector.extract_strided_slice %3 {offsets = [0, 320], sizes = [64, 32], strides = [1, 1]} : vector<64x384xf32> to vector<64x32xf32>
    %68 = vector.shape_cast %67 : vector<64x32xf32> to vector<4x16x32xf32>
    "tpu.trace_start"() <{level = 10 : i32, message = "bqd,bkd->bqk"}> : () -> ()
    %cst_22 = arith.constant dense<0.000000e+00> : vector<4x16x16xf32>
    %69 = tpu.matmul %64, %66, %cst_22 {dimension_numbers = #tpu.dot_dimension_numbers<[2], [2], [1], [1], [0, 0, 0, 1, 1, 1], [0], [0]>} : vector<4x16x32xf32>, vector<4x16x32xf32>, vector<4x16x16xf32> -> vector<4x16x16xf32>
    %cst_23 = arith.constant 0xFF800000 : f32
    "tpu.trace_stop"() : () -> ()
    %70 = vector.shape_cast %7 : vector<1x16x16xi1> to vector<1x16x16xi1>
    %71 = vector.broadcast %70 : vector<1x16x16xi1> to vector<4x16x16xi1>
    %72 = vector.broadcast %cst_23 : f32 to vector<4x16x16xf32>
    %73 = arith.select %71, %69, %72 : vector<4x16x16xi1>, vector<4x16x16xf32>
    %cst_24 = arith.constant dense<0xFF800000> : vector<4x16xf32>
    %74 = vector.multi_reduction <maximumf>, %73, %cst_24 [2] : vector<4x16x16xf32> to vector<4x16xf32>
    %75 = vector.shape_cast %74 : vector<4x16xf32> to vector<4x16x1xf32>
    %76 = vector.broadcast %75 : vector<4x16x1xf32> to vector<4x16x16xf32>
    %77 = arith.subf %73, %76 : vector<4x16x16xf32>
    %78 = math.exp %77 : vector<4x16x16xf32>
    %cst_25 = arith.constant dense<0.000000e+00> : vector<4x16xf32>
    %79 = vector.multi_reduction <add>, %78, %cst_25 [2] : vector<4x16x16xf32> to vector<4x16xf32>
    %80 = vector.shape_cast %79 : vector<4x16xf32> to vector<4x16x1xf32>
    %81 = tpu.reciprocal %80 {approx = true} : vector<4x16x1xf32> -> vector<4x16x1xf32>
    %82 = vector.broadcast %81 : vector<4x16x1xf32> to vector<4x16x16xf32>
    %83 = arith.mulf %78, %82 : vector<4x16x16xf32>
    "tpu.trace_start"() <{level = 10 : i32, message = "bqk,bkd->bqd"}> : () -> ()
    %cst_26 = arith.constant dense<0.000000e+00> : vector<4x16x32xf32>
    %84 = tpu.matmul %83, %68, %cst_26 {dimension_numbers = #tpu.dot_dimension_numbers<[2], [1], [1], [2], [0, 0, 0, 1, 1, 2], [0], [0]>} : vector<4x16x16xf32>, vector<4x16x32xf32>, vector<4x16x32xf32> -> vector<4x16x32xf32>
    "tpu.trace_stop"() : () -> ()
    %85 = vector.shape_cast %84 : vector<4x16x32xf32> to vector<64x32xf32>
    %c2 = arith.constant 2 : index
    %c0_27 = arith.constant 0 : index
    %c0_28 = arith.constant 0 : index
    %86 = vector.load %arg3[%c2, %c0_27, %c0_28] : memref<4x32x128xf32, #tpu.memory_space<vmem>>, vector<1x32x128xf32>
    %87 = vector.shape_cast %86 : vector<1x32x128xf32> to vector<32x128xf32>
    %cst_29 = arith.constant dense<0.000000e+00> : vector<64x128xf32>
    %88 = tpu.matmul %85, %87, %cst_29 {dimension_numbers = #tpu.dot_dimension_numbers<[1], [0], [0], [1], [0, 0, 1, 1], [], []>} : vector<64x32xf32>, vector<32x128xf32>, vector<64x128xf32> -> vector<64x128xf32>
    %89 = arith.addf %62, %88 : vector<64x128xf32>
    %90 = vector.extract_strided_slice %3 {offsets = [0, 96], sizes = [64, 32], strides = [1, 1]} : vector<64x384xf32> to vector<64x32xf32>
    %91 = vector.shape_cast %90 : vector<64x32xf32> to vector<4x16x32xf32>
    %92 = vector.extract_strided_slice %3 {offsets = [0, 224], sizes = [64, 32], strides = [1, 1]} : vector<64x384xf32> to vector<64x32xf32>
    %93 = vector.shape_cast %92 : vector<64x32xf32> to vector<4x16x32xf32>
    %94 = vector.extract_strided_slice %3 {offsets = [0, 352], sizes = [64, 32], strides = [1, 1]} : vector<64x384xf32> to vector<64x32xf32>
    %95 = vector.shape_cast %94 : vector<64x32xf32> to vector<4x16x32xf32>
    "tpu.trace_start"() <{level = 10 : i32, message = "bqd,bkd->bqk"}> : () -> ()
    %cst_30 = arith.constant dense<0.000000e+00> : vector<4x16x16xf32>
    %96 = tpu.matmul %91, %93, %cst_30 {dimension_numbers = #tpu.dot_dimension_numbers<[2], [2], [1], [1], [0, 0, 0, 1, 1, 1], [0], [0]>} : vector<4x16x32xf32>, vector<4x16x32xf32>, vector<4x16x16xf32> -> vector<4x16x16xf32>
    %cst_31 = arith.constant 0xFF800000 : f32
    "tpu.trace_stop"() : () -> ()
    %97 = vector.shape_cast %7 : vector<1x16x16xi1> to vector<1x16x16xi1>
    %98 = vector.broadcast %97 : vector<1x16x16xi1> to vector<4x16x16xi1>
    %99 = vector.broadcast %cst_31 : f32 to vector<4x16x16xf32>
    %100 = arith.select %98, %96, %99 : vector<4x16x16xi1>, vector<4x16x16xf32>
    %cst_32 = arith.constant dense<0xFF800000> : vector<4x16xf32>
    %101 = vector.multi_reduction <maximumf>, %100, %cst_32 [2] : vector<4x16x16xf32> to vector<4x16xf32>
    %102 = vector.shape_cast %101 : vector<4x16xf32> to vector<4x16x1xf32>
    %103 = vector.broadcast %102 : vector<4x16x1xf32> to vector<4x16x16xf32>
    %104 = arith.subf %100, %103 : vector<4x16x16xf32>
    %105 = math.exp %104 : vector<4x16x16xf32>
    %cst_33 = arith.constant dense<0.000000e+00> : vector<4x16xf32>
    %106 = vector.multi_reduction <add>, %105, %cst_33 [2] : vector<4x16x16xf32> to vector<4x16xf32>
    %107 = vector.shape_cast %106 : vector<4x16xf32> to vector<4x16x1xf32>
    %108 = tpu.reciprocal %107 {approx = true} : vector<4x16x1xf32> -> vector<4x16x1xf32>
    %109 = vector.broadcast %108 : vector<4x16x1xf32> to vector<4x16x16xf32>
    %110 = arith.mulf %105, %109 : vector<4x16x16xf32>
    "tpu.trace_start"() <{level = 10 : i32, message = "bqk,bkd->bqd"}> : () -> ()
    %cst_34 = arith.constant dense<0.000000e+00> : vector<4x16x32xf32>
    %111 = tpu.matmul %110, %95, %cst_34 {dimension_numbers = #tpu.dot_dimension_numbers<[2], [1], [1], [2], [0, 0, 0, 1, 1, 2], [0], [0]>} : vector<4x16x16xf32>, vector<4x16x32xf32>, vector<4x16x32xf32> -> vector<4x16x32xf32>
    "tpu.trace_stop"() : () -> ()
    %112 = vector.shape_cast %111 : vector<4x16x32xf32> to vector<64x32xf32>
    %c3 = arith.constant 3 : index
    %c0_35 = arith.constant 0 : index
    %c0_36 = arith.constant 0 : index
    %113 = vector.load %arg3[%c3, %c0_35, %c0_36] : memref<4x32x128xf32, #tpu.memory_space<vmem>>, vector<1x32x128xf32>
    %114 = vector.shape_cast %113 : vector<1x32x128xf32> to vector<32x128xf32>
    %cst_37 = arith.constant dense<0.000000e+00> : vector<64x128xf32>
    %115 = tpu.matmul %112, %114, %cst_37 {dimension_numbers = #tpu.dot_dimension_numbers<[1], [0], [0], [1], [0, 0, 1, 1], [], []>} : vector<64x32xf32>, vector<32x128xf32>, vector<64x128xf32> -> vector<64x128xf32>
    %116 = arith.addf %89, %115 : vector<64x128xf32>
    %c0_38 = arith.constant 0 : index
    %c0_39 = arith.constant 0 : index
    %117 = vector.load %arg4[%c0_38, %c0_39] : memref<1x128xf32, #tpu.memory_space<vmem>>, vector<1x128xf32>
    %118 = vector.broadcast %117 : vector<1x128xf32> to vector<64x128xf32>
    %119 = arith.addf %116, %118 : vector<64x128xf32>
    %120 = vector.shape_cast %119 : vector<64x128xf32> to vector<4x16x128xf32>
    %c0_40 = arith.constant 0 : index
    %c0_41 = arith.constant 0 : index
    %c0_42 = arith.constant 0 : index
    %121 = vector.load %arg5[%c0_40, %c0_41, %c0_42] : memref<4x16x128xf32, #tpu.memory_space<vmem>>, vector<4x16x128xf32>
    tpu.vector_store %arg5[%c0_40, %c0_41, %c0_42], %120 {strides = array<i32>} : memref<4x16x128xf32, #tpu.memory_space<vmem>>, vector<4x16x128xf32>,
    return
  }
  func.func @transform_0(%arg0: i32) -> (i32, i32, i32) {
    %c0_i32 = arith.constant 0 : i32
    %c0_i32_0 = arith.constant 0 : i32
    %c0_i32_1 = arith.constant 0 : i32
    return %arg0, %c0_i32, %c0_i32_0 : i32, i32, i32
  }
  func.func @transform_1(%arg0: i32) -> (i32, i32) {
    %c0_i32 = arith.constant 0 : i32
    %c0_i32_0 = arith.constant 0 : i32
    %c0_i32_1 = arith.constant 0 : i32
    return %c0_i32, %c0_i32_0 : i32, i32
  }
  func.func @transform_2(%arg0: i32) -> (i32, i32, i32) {
    %c0_i32 = arith.constant 0 : i32
    %c0_i32_0 = arith.constant 0 : i32
    %c0_i32_1 = arith.constant 0 : i32
    %c0_i32_2 = arith.constant 0 : i32
    return %c0_i32, %c0_i32_0, %c0_i32_1 : i32, i32, i32
  }
  func.func @transform_3(%arg0: i32) -> (i32, i32) {
    %c0_i32 = arith.constant 0 : i32
    %c0_i32_0 = arith.constant 0 : i32
    %c0_i32_1 = arith.constant 0 : i32
    return %c0_i32, %c0_i32_0 : i32, i32
  }
  func.func @transform_4(%arg0: i32) -> (i32, i32, i32) {
    %c0_i32 = arith.constant 0 : i32
    %c0_i32_0 = arith.constant 0 : i32
    %c0_i32_1 = arith.constant 0 : i32
    return %arg0, %c0_i32, %c0_i32_0 : i32, i32, i32
  }
}

</mosaic_0001>

<bundles_post_ra>
// kernel: tpu_custom_call.1
= control target key start
LH: loop header
LB: loop body
LE: loop exit
PB: predicated region body
PF: predicated region fallthrough
CT: control target
= control target key end

     0   :  { %9 = vsyncpa [#allocation3], 0  ;;  %s3941_s0 = inlined_call_operand.hbm [shape: f32[8,16,128], index: 0, kind: input, shape index: {}]   ;;  %s3942_s1 = inlined_call_operand.hbm [shape: f32[128,384], index: 1, kind: input, shape index: {}]   ;;  %s3943_s2 = inlined_call_operand.hbm [shape: f32[4,32,128], index: 2, kind: input, shape index: {}]   ;;  %s3944_s3 = inlined_call_operand.vmem [shape: f32[1,128], index: 3, kind: input, shape index: {}]   ;;  %s3945_s4 = inlined_call_operand.hbm [shape: f32[8,16,128], index: 4, kind: output, shape index: {}]  }
   0x1   :  { %11 = vsyncpa [#allocation3 + $0x1], 0 }
   0x2   :  { %12 = vsyncpa [#allocation6], 0 }
   0x3   :  { %13 = vsyncpa [#allocation4], 0 }
   0x4   :  { %15 = vsyncpa [#allocation4 + $0x1], 0  ;;  %s3027_s15 = smov 0   ;;  %s3029_s16 = smov 0  }
   0x5   :  { %s3031_s17 = smov 0   ;;  %s3033_s18 = smov 0  }
   0x6 LB: > { %s3048_s19 = sadd.s32 4294967295, %s2989_s18   ;;  %s2406_s20 = sadd.s32 4294967294, %s2989_s18   ;;  %s2989_s18 = sphi %s3033_s18, %s3959_s18   ;;  %s2985_s17 = sphi %s3031_s17, %s3958_s17   ;;  %s2981_s16 = sphi %s3029_s16, %s3957_s16   ;;  %s2977_s15 = sphi %s3027_s15, %s3956_s15  }
   0x7   : > { %p41_p0 = scmp.ne.s32.totalorder %s2981_s16, %s2977_s15  ;;  %p42_p1 = scmp.eq.s32.totalorder %s3048_s19, 0 }
   0x8   : > { %p128_p2 = scmp.eq.s32.totalorder %s3048_s19, 1  ;;  %p134_p3 = scmp.eq.s32.totalorder %s2406_s20, 1 }
   0x9   : > { %p3057_p4 = por %p42_p1, %p41_p0  ;;  %p2407_p5 = scmp.ge.s32.totalorder %s2989_s18, 1 }
   0xa   : > { %p3062_p6 = por %p134_p3, %p41_p0  ;;  %p141_p7 = scmp.lt.s32.totalorder %s2989_s18, 3 }
   0xb   : > { %s152_s25 = sshll.u32 %s3942_s1, 4  ;;  %s2991_s27 = smov [#allocation5]   ;;  %s153_s25 = int_to_ptr.hbm [resolvable:$true] %s152_s25 }
   0xc   : > { %p3070_p8 = pnand %p2407_p5, %p141_p7  ;;  %s154_s28 = sshll.u32 %s2991_s27, 4  ;;  %s155_s28 = int_to_ptr.vmem [resolvable:$true] %s154_s28 }
   0xd   : > { %s166_s5 = sshll.u32 %s3943_s2, 4  ;;  %s2992_s6 = smov 384   ;;  %s167_s5 = int_to_ptr.hbm [resolvable:$true] %s166_s5 }
   0xe   : > { %p2576_p9 = pneg %p3070_p8  ;;  %s2993_s7 = smov 24  }
   0xf   : > { %s2994_s8 = smov [#allocation7]   ;;  %s2995_s10 = smov 128  }
  0x10   : > { %p2577_p10 = pnand %p2576_p9, %p42_p1  ;;  %s168_s9 = sshll.u32 %s2994_s8, 4  ;;  %s169_s9 = int_to_ptr.vmem [resolvable:$true] %s168_s9 }
  0x11   : > { %s2996_s11 = smov 8   ;;  %s3086_s12 = sadd.s32 1, %s2989_s18  }
  0x12   : > { %2579 = dma.hbm_to_vmem [thread:$0]  (!%p2577_p10), %s153_s25, 6144, %s155_s28, [#allocation6], %s2992_s6, %s2992_s6, %s2993_s7  }
  0x13   : > { %2582 = dma.hbm_to_vmem [thread:$0]  (!%p2577_p10), %s167_s5, 2048, %s169_s9, [#allocation6], %s2995_s10, %s2995_s10, %s2996_s11  }
  0x14   : > { %s25_s13 = ssub.s32 %s2989_s18, %s3086_s12  ;;  %s28_s14 = sadd.s32 1, %s2985_s17 }
  0x15   : > { %p26_p12 = scmp.eq.s32.totalorder %s25_s13, 0  ;;  %p35_p13 = scmp.ne.s32.totalorder %s2985_s17, %s2981_s16 }
  0x16   : > { %p36_p0 = scmp.eq.s32.totalorder %s2989_s18, 0  ;;  %p2593_p7 = scmp.lt.s32.totalorder %s2989_s18, 2 }
  0x17   : > { %s3095_s20 = scalar_select %p26_p12, %s2985_s17, %s28_s14  }
  0x18   : > { %p37_p3 = por %p36_p0, %p35_p13  ;;  %p3099_p5 = por %p128_p2, %p35_p13 }
  0x19   : > { %s185_s24 = sand.u32 1, %s2985_s17   ;;  %s2555_s27 = sshll.u32 %s2989_s18, 6 }
  0x1a   : > { %s2411_s25 = sshll.u32 %s185_s24, 6  ;;  %s195_s30 = scalar_lea.hbm %s3941_s0, %s2555_s27 }
  0x1b   : > { %s189_s5 = scalar_lea.vmem [#allocation2], %s2411_s25  ;;  %s196_s7 = sshll.u32 %s195_s30, 4  ;;  %s197_s7 = int_to_ptr.hbm [resolvable:$true] %s196_s7 }
  0x1c   : > { %s198_s6 = sshll.u32 %s189_s5, 4  ;;  %p3109_p9 = pnand %p2593_p7, %p37_p3  ;;  %s199_s6 = int_to_ptr.vmem [resolvable:$true] %s198_s6 }
  0x1d   : > { %s186_s9 = scalar_lea.sflag [#allocation3], %s185_s24  ;;  %s2889_s13 = sshra.s32 %s197_s7, 4  ;;  %s2890_s13 = int_to_ptr.hbm [resolvable:$true] %s2889_s13 }
  0x1e   : > { %s2891_s14 = scalar_lea.hbm %s2890_s13, 64  ;;  %p2893_p10 = pneg %p3109_p9 }
  0x1f   : > { %p2892_p2 = scmp.ne.s32.totalorder %s2890_s13, %s2891_s14  ;;  %s2896_s28 = scalar_lea.hbm %s3941_s0, 128 }
  0x20   : > { %p2897_p0 = scmp.lt.s32.totalorder %s2890_s13, %s3941_s0  ;;  %p2898_p3 = scmp.lt.s32.totalorder %s2896_s28, %s2891_s14 }
  0x21   : > { %p2894_p12 = pnand %p2893_p10, %p2892_p2 }
  0x22   : > { %p2899_p7 = por %p2898_p3, %p2897_p0 }
  0x23   : > { %p2895_p13 = pneg %p2894_p12 }
  0x25   : > { %p2900_p11 = pnand %p2899_p7, %p2895_p13 }
  0x27   : > { %2903 = shalt.err (!%p2900_p11)
}
  0x28   : > { %2586 = dma.hbm_to_vmem [thread:$0]  (!%p3109_p9), %s197_s7, 1024, %s199_s6, %s186_s9, %s2995_s10, %s2995_s10, %s2996_s11  }
  0x29   : > { %210 = sbr.rel (%p3070_p8) target bundleno = 2374 (0x946), region = 36  ;;  %s3129_s24 = sand.u32 (!%p3070_p8), 1, %s2981_s16  }
  0x2a   : > { %s2416_s5 = sshll.u32 (!%p3070_p8), %s3129_s24, 6  ;;  %s213_s13 = scalar_lea.sflag (!%p3070_p8), [#allocation3], %s3129_s24 }
  0x2b   : > { %s3135_s14 = scalar_lea.vmem (!%p3070_p8), [#allocation2], %s2416_s5 }
  0x2e   : > { %2964 = dma.done.wait (%p3057_p4), %s213_s13, 1024  }
  0x2f   : > { %2966 = vsyncadd (%p3057_p4), %s213_s13, 4294966272 }
  0x30   : > { %2968 = dma.done.wait (%p42_p1), [#allocation6], 8192  }
  0x31   : > { %2970 = vsyncadd (%p42_p1), [#allocation6], 4294959104  ;;  %v307_v0 = vld [vmem:[#allocation5 + $0x168] sm:$0xff]  ;;  %v308_v1 = vld [vmem:[#allocation5 + $0x170] sm:$0xff]  ;;  %vm440_vm0 = vcmask 261120   ;;  %s2997_s21 = smov 96  }
  0x32   : > { %v304_v2 = vld [vmem:[#allocation5 + $0x150] sm:$0xff]  ;;  %310 = vmatpush.msra.mxu0 %v307_v0  ;;  %351 = vmatpush.msra.mxu1 %v308_v1  ;;  %v305_v3 = vld [vmem:[#allocation5 + $0x158] sm:$0xff]  ;;  %v302_v5 = vld [vmem:[#allocation5 + $0x140] sm:$0xff]  ;;  %vm593_vm2 = vcmask 130048   ;;  %s2998_s26 = smov 64   ;;  %s2999_s10 = smov 32  }
  0x33   : > { %v301_v4 = vld [vmem:[#allocation5 + $0x138] sm:$0xff]  ;;  %v298_v6 = vld [vmem:[#allocation5 + $0x120] sm:$0xff]  ;;  %v299_v7 = vld [vmem:[#allocation5 + $0x128] sm:$0xff]  ;;  %s3891_s7 = scalar_lea.vmem [#allocation8], %s2416_s5  ;;  %s2557_s8 = sshll.u32 %s3048_s19, 6 }
  0x34   : > { %311 = vmatpush.msra.mxu0 %v304_v2  ;;  %352 = vmatpush.msra.mxu1 %v305_v3  ;;  %v295_v8 = vld [vmem:[#allocation5 + $0x108] sm:$0xff]  ;;  %v296_v9 = vld [vmem:[#allocation5 + $0x110] sm:$0xff]  ;;  %v293_v11 = vld [vmem:[#allocation5 + $0xf8] sm:$0xff]  ;;  %s2310_s25 = scalar_lea.hbm %s3945_s4, %s2557_s8  ;;  %s2311_s28 = sshll.u32 %s3891_s7, 4  ;;  %s2312_s28 = int_to_ptr.vmem [resolvable:$true] %s2311_s28 }
  0x35   : > { %v292_v10 = vld [vmem:[#allocation5 + $0xf0] sm:$0xff]  ;;  %v289_v12 = vld [vmem:[#allocation5 + $0xd8] sm:$0xff]  ;;  %v290_v13 = vld [vmem:[#allocation5 + $0xe0] sm:$0xff]  ;;  %s2313_s29 = sshll.u32 %s2310_s25, 4  ;;  %s2298_s30 = scalar_lea.sflag [#allocation4], %s3129_s24  ;;  %s2314_s29 = int_to_ptr.hbm [resolvable:$true] %s2313_s29 }
  0x36   : > { %312 = vmatpush.msra.mxu0 %v301_v4  ;;  %353 = vmatpush.msra.mxu1 %v302_v5  ;;  %v286_v14 = vld [vmem:[#allocation5 + $0xc0] sm:$0xff]  ;;  %v287_v15 = vld [vmem:[#allocation5 + $0xc8] sm:$0xff]  ;;  %v284_v17 = vld [vmem:[#allocation5 + $0xb0] sm:$0xff]  ;;  %s2933_s5 = sshra.s32 %s2314_s29, 4  ;;  %s2934_s5 = int_to_ptr.hbm [resolvable:$true] %s2933_s5 }
  0x37   : > { %v283_v16 = vld [vmem:[#allocation5 + $0xa8] sm:$0xff]  ;;  %v280_v18 = vld [vmem:[#allocation5 + $0x90] sm:$0xff]  ;;  %v281_v19 = vld [vmem:[#allocation5 + $0x98] sm:$0xff]  ;;  %s2935_s13 = scalar_lea.hbm %s2934_s5, 64  ;;  %p2940_p11 = scmp.lt.s32.totalorder %s2934_s5, %s3945_s4 }
  0x38   : > { %313 = vmatpush.msra.mxu0 %v298_v6  ;;  %354 = vmatpush.msra.mxu1 %v299_v7  ;;  %v277_v20 = vld [vmem:[#allocation5 + $0x78] sm:$0xff]  ;;  %v278_v21 = vld [vmem:[#allocation5 + $0x80] sm:$0xff]  ;;  %v275_v23 = vld [vmem:[#allocation5 + $0x68] sm:$0xff]  ;;  %p2936_p1 = scmp.ne.s32.totalorder %s2934_s5, %s2935_s13 }
  0x39   : > { %v274_v22 = vld [vmem:[#allocation5 + $0x60] sm:$0xff]  ;;  %v271_v24 = vld [vmem:[#allocation5 + $0x48] sm:$0xff]  ;;  %v272_v25 = vld [vmem:[#allocation5 + $0x50] sm:$0xff] }
  0x3a   : > { %314 = vmatpush.msra.mxu0 %v295_v8  ;;  %355 = vmatpush.msra.mxu1 %v296_v9  ;;  %v268_v26 = vld [vmem:[#allocation5 + $0x30] sm:$0xff]  ;;  %v269_v27 = vld [vmem:[#allocation5 + $0x38] sm:$0xff]  ;;  %v266_v29 = vld [vmem:[#allocation5 + $0x20] sm:$0xff]  ;;  %p2937_p4 = pnand %p2936_p1, %p3099_p5 }
  0x3b   : > { %v265_v28 = vld [vmem:[#allocation5 + $0x18] sm:$0xff]  ;;  %v262_v30 = vld [vmem:[#allocation5] sm:$0xff]  ;;  %v263_v31 = vld [vmem:[#allocation5 + $0x8] sm:$0xff] }
  0x3c   : > { %315 = vmatpush.msra.mxu0 %v292_v10  ;;  %356 = vmatpush.msra.mxu1 %v293_v11  ;;  %v254_v32 = vld [vmem:[%s3135_s14] sm:$0xff]  ;;  %v255_v33 = vld [vmem:[%s3135_s14 + $0x8] sm:$0xff]  ;;  %v256_v34 = vld [vmem:[%s3135_s14 + $0x10] sm:$0xff]  ;;  %p2938_p8 = pneg %p2937_p4 }
  0x3d   : > { %v257_v35 = vld [vmem:[%s3135_s14 + $0x18] sm:$0xff]  ;;  %v306_v37 = vld [vmem:[#allocation5 + $0x160] sm:$0xff]  ;;  %v303_v38 = vld [vmem:[#allocation5 + $0x148] sm:$0xff] }
  0x3e   : > { %316 = vmatpush.msra.mxu0 %v289_v12  ;;  %357 = vmatpush.msra.mxu1 %v290_v13  ;;  %v309_v36 = vld [vmem:[#allocation5 + $0x178] sm:$0xff]  ;;  %v300_v39 = vld [vmem:[#allocation5 + $0x130] sm:$0xff]  ;;  %v258_v41 = vld [vmem:[%s3135_s14 + $0x20] sm:$0xff] }
  0x3f   : > { %392 = vmatpush.msra.mxu2 %v309_v36  ;;  %v297_v40 = vld [vmem:[#allocation5 + $0x118] sm:$0xff]  ;;  %v294_v42 = vld [vmem:[#allocation5 + $0x100] sm:$0xff]  ;;  %v291_v43 = vld [vmem:[#allocation5 + $0xe8] sm:$0xff] }
  0x40   : > { %317 = vmatpush.msra.mxu0 %v286_v14  ;;  %358 = vmatpush.msra.mxu1 %v287_v15  ;;  %v288_v44 = vld [vmem:[#allocation5 + $0xd0] sm:$0xff]  ;;  %v285_v45 = vld [vmem:[#allocation5 + $0xb8] sm:$0xff]  ;;  %v259_v46 = vld [vmem:[%s3135_s14 + $0x28] sm:$0xff] }
  0x41   : > { %393 = vmatpush.msra.mxu2 %v306_v37  ;;  %v282_v47 = vld [vmem:[#allocation5 + $0xa0] sm:$0xff]  ;;  %v279_v48 = vld [vmem:[#allocation5 + $0x88] sm:$0xff]  ;;  %v276_v49 = vld [vmem:[#allocation5 + $0x70] sm:$0xff] }
  0x42   : > { %318 = vmatpush.msra.mxu0 %v283_v16  ;;  %359 = vmatpush.msra.mxu1 %v284_v17  ;;  %v273_v50 = vld [vmem:[#allocation5 + $0x58] sm:$0xff]  ;;  %v260_v51 = vld [vmem:[%s3135_s14 + $0x30] sm:$0xff]  ;;  %v270_v52 = vld [vmem:[#allocation5 + $0x40] sm:$0xff] }
  0x43   : > { %394 = vmatpush.msra.mxu2 %v303_v38  ;;  %v267_v53 = vld [vmem:[#allocation5 + $0x28] sm:$0xff]  ;;  %v264_v54 = vld [vmem:[#allocation5 + $0x10] sm:$0xff]  ;;  %v261_v55 = vld [vmem:[%s3135_s14 + $0x38] sm:$0xff] }
  0x44   : > { %319 = vmatpush.msra.mxu0 %v280_v18  ;;  %360 = vmatpush.msra.mxu1 %v281_v19 }
  0x45   : > { %395 = vmatpush.msra.mxu2 %v300_v39 }
  0x46   : > { %320 = vmatpush.msra.mxu0 %v277_v20  ;;  %361 = vmatpush.msra.mxu1 %v278_v21  ;;  %v433_v20 = vlaneseq }
  0x47   : > { %396 = vmatpush.msra.mxu2 %v297_v40 }
  0x48   : > { %321 = vmatpush.msra.mxu0 %v274_v22  ;;  %362 = vmatpush.msra.mxu1 %v275_v23  ;;  %v434_v22 = vshrl.u32 %v433_v20, 7  ;;  %v437_v23 = vand.u32 127, %v433_v20 }
  0x49   : > { %397 = vmatpush.msra.mxu2 %v294_v42 }
  0x4a   : > { %322 = vmatpush.msra.mxu0 %v271_v24  ;;  %363 = vmatpush.msra.mxu1 %v272_v25  ;;  %vm3256_vm1 = vcmp.le.s32.totalorder %v437_v23, %v434_v22 }
  0x4b   : > { %398 = vmatpush.msra.mxu2 %v291_v43 }
  0x4c   : > { %323 = vmatpush.msra.mxu0 %v268_v26  ;;  %364 = vmatpush.msra.mxu1 %v269_v27 }
  0x4d   : > { %399 = vmatpush.msra.mxu2 %v288_v44 }
  0x4e   : > { %324 = vmatpush.msra.mxu0 %v265_v28  ;;  %365 = vmatpush.msra.mxu1 %v266_v29  ;;  %v435_v28 = vadd.s32 8, %v434_v22 }
  0x4f   : > { %400 = vmatpush.msra.mxu2 %v285_v45 }
  0x50   : > { %325 = vmatpush.msra.mxu0 %v262_v30  ;;  %366 = vmatpush.msra.mxu1 %v263_v31  ;;  %vm3263_vm3 = vcmp.le.s32.totalorder %v437_v23, %v435_v28 }
  0x51   : > { %326 = vmatmul.f32.vlgmr.msra.gmra.mxu0 %v254_v32  ;;  %367 = vmatmul.f32.vlgmr.msra.gmra.mxu1 %v254_v32 }
  0x52   : > { %401 = vmatpush.msra.mxu2 %v282_v47 }
  0x54   : > { %402 = vmatpush.msra.mxu2 %v279_v48 }
  0x56   : > { %403 = vmatpush.msra.mxu2 %v276_v49 }
  0x58   : > { %404 = vmatpush.msra.mxu2 %v273_v50 }
  0x59   : > { %329 = vmatmul.f32.gmra.mxu0 %v255_v33  ;;  %370 = vmatmul.f32.gmra.mxu1 %v255_v33 }
  0x5a   : > { %405 = vmatpush.msra.mxu2 %v270_v52 }
  0x5c   : > { %406 = vmatpush.msra.mxu2 %v267_v53 }
  0x5e   : > { %407 = vmatpush.msra.mxu2 %v264_v54 }
  0x5f   : > { %408 = vmatmul.f32.vlgmr.msra.gmra.mxu2 %v254_v32 }
  0x61   : > { %332 = vmatmul.f32.gmra.mxu0 %v256_v34  ;;  %373 = vmatmul.f32.gmra.mxu1 %v256_v34 }
  0x67   : > { %411 = vmatmul.f32.gmra.mxu2 %v255_v33 }
  0x69   : > { %335 = vmatmul.f32.gmra.mxu0 %v257_v35  ;;  %376 = vmatmul.f32.gmra.mxu1 %v257_v35 }
  0x6f   : > { %414 = vmatmul.f32.gmra.mxu2 %v256_v34 }
  0x71   : > { %338 = vmatmul.f32.gmra.mxu0 %v258_v41  ;;  %379 = vmatmul.f32.gmra.mxu1 %v258_v41 }
  0x77   : > { %417 = vmatmul.f32.gmra.mxu2 %v257_v35 }
  0x79   : > { %341 = vmatmul.f32.gmra.mxu0 %v259_v46  ;;  %382 = vmatmul.f32.gmra.mxu1 %v259_v46 }
  0x7f   : > { %420 = vmatmul.f32.gmra.mxu2 %v258_v41 }
  0x81   : > { %344 = vmatmul.f32.gmra.mxu0 %v260_v51  ;;  %385 = vmatmul.f32.gmra.mxu1 %v260_v51 }
  0x87   : > { %423 = vmatmul.f32.gmra.mxu2 %v259_v46 }
  0x89   : > { %347 = vmatmul.f32.gmra.mxu0 %v261_v55  ;;  %388 = vmatmul.f32.gmra.mxu1 %v261_v55 }
  0x8f   : > { %426 = vmatmul.f32.gmra.mxu2 %v260_v51 }
  0x97   : > { %429 = vmatmul.f32.gmra.mxu2 %v261_v55 }
  0xce   : > { %v3153_v56 = vpop.f32.mrf.mxu0  ;;  %v3155_v57 = vpop.f32.mrf.mxu1 }
  0xd6   : > { %v3157_v58 = vpop.f32.mrf.mxu0  ;;  %v3159_v59 = vpop.f32.mrf.mxu1 }
  0xd7   : > { %2420 = vmatpush.xpose.msk.msrb.mxu0 %vm440_vm0, %v3159_v59  ;;  %2558 = vmatpush.xpose.msk.msrb.mxu2 %vm440_vm0, %v3159_v59 }
  0xdb   : > { %2421 = vmatpush.xpose.msk.msrb.mxu0 %vm440_vm0, %v3155_v57  ;;  %2559 = vmatpush.xpose.msk.msrb.mxu2 %vm440_vm0, %v3155_v57 }
  0xde   : > { %v3169_v60 = vpop.f32.mrf.mxu0  ;;  %v3171_v61 = vpop.f32.mrf.mxu1  ;;  %2422 = vmatmul.msk.f32.vlgmr.msrb.gmra.mxu0 %vm440_vm0, %v3153_v56  ;;  %2423 = vmatmul.msk.f32.vlgmr.msrb.gmra.mxu2 %vm440_vm0, %v3157_v58 }
  0xe2   : > { %v3219_v8 = vpop.f32.mrf.mxu2 }
  0xe6   : > { %v3177_v62 = vpop.f32.mrf.mxu0  ;;  %v3179_v63 = vpop.f32.mrf.mxu1 }
  0xe7   : > { %2424 = vmatpush.xpose.msk.msra.mxu3 %vm440_vm0, %v3179_v63 }
  0xea   : > { %v3227_v9 = vpop.f32.mrf.mxu2 }
  0xeb   : > { %2425 = vmatpush.xpose.msk.msra.mxu3 %vm440_vm0, %v3171_v61 }
  0xee   : > { %v3185_v0 = vpop.f32.mrf.mxu0  ;;  %v3187_v1 = vpop.f32.mrf.mxu1  ;;  %2426 = vmatmul.msk.f32.vlgmr.msra.gmra.mxu3 %vm440_vm0, %v3169_v60 }
  0xf2   : > { %v3233_v10 = vpop.f32.mrf.mxu2 }
  0xf6   : > { %v3191_v2 = vpop.f32.mrf.mxu0  ;;  %v3193_v3 = vpop.f32.mrf.mxu1  ;;  %2427 = vmatmul.msk.f32.gmra.mxu3 %vm440_vm0, %v3177_v62 }
  0xf7   : > { %2428 = vmatpush.xpose.msk.msrb.mxu3 %vm440_vm0, %v3193_v3 }
  0xfa   : > { %v3235_v11 = vpop.f32.mrf.mxu2 }
  0xfb   : > { %2429 = vmatpush.xpose.msk.msrb.mxu3 %vm440_vm0, %v3187_v1 }
  0xfe   : > { %v3201_v4 = vpop.f32.mrf.mxu0  ;;  %v3203_v5 = vpop.f32.mrf.mxu1  ;;  %2430 = vmatmul.msk.f32.vlgmr.msrb.gmra.mxu3 %vm440_vm0, %v3185_v0 }
  0xff   : > { %919 = vrot.lane.b32.xlu2 %v3201_v4, %s2997_s21 }
 0x102   : > { %v3239_v12 = vpop.f32.mrf.mxu2 }
 0x106   : > { %v3209_v6 = vpop.f32.mrf.mxu0  ;;  %v3211_v7 = vpop.f32.mrf.mxu1  ;;  %2431 = vmatmul.msk.f32.gmra.mxu3 %vm440_vm0, %v3191_v2 }
 0x107   : > { %2432 = vmatpush.xpose.msk.msra.mxu3 %vm440_vm0, %v3211_v7  ;;  %921 = vrot.lane.b32.xlu2 %v3209_v6, %s2997_s21 }
 0x10a   : > { %v3241_v13 = vpop.f32.mrf.mxu2 }
 0x10b   : > { %2433 = vmatpush.xpose.msk.msra.mxu3 %vm440_vm0, %v3203_v5  ;;  %760 = vmatpush.msra.mxu0 %v3241_v13 }
 0x10d   : > { %761 = vmatpush.msra.mxu0 %v3239_v12 }
 0x10e   : > { %2434 = vmatmul.msk.f32.vlgmr.msra.gmra.mxu3 %vm440_vm0, %v3201_v4 }
 0x10f   : > { %886 = vrot.lane.b32.xlu2 %v3193_v3, %s2997_s21  ;;  %702 = vmatpush.msrb.mxu3 %v3227_v9 }
 0x111   : > { %703 = vmatpush.msrb.mxu3 %v3219_v8 }
 0x112   : > { %v3245_v14 = vpop.f32.mrf.mxu2 }
 0x113   : > { %731 = vmatpush.msra.mxu3 %v3235_v11 }
 0x115   : > { %732 = vmatpush.msra.mxu3 %v3233_v10 }
 0x116   : > { %2435 = vmatmul.msk.f32.gmra.mxu3 %vm440_vm0, %v3209_v6 }
 0x11a   : > { %v3247_v15 = vpop.f32.mrf.mxu2 }
 0x11b   : > { %789 = vmatpush.msrb.mxu1 %v3247_v15 }
 0x11d   : > { %790 = vmatpush.msrb.mxu1 %v3245_v14 }
 0x159   : > { %v3251_v16 = vpop.permute.xlu2 %919 }
 0x15b   : > { %v470_v47 = vpop.f32.mrf.mxu0 }
 0x15c   : > { %v585_v49 = vsel %vm3256_vm1, %v470_v47, -inf }
 0x15d   : > { %v594_v54 = vsel %vm593_vm2, %v585_v49, -inf }
 0x161   : > { %v3253_v17 = vpop.permute.xlu2 %921 }
 0x169   : > { %v887_v18 = vpop.permute.xlu2 %886 }
 0x16a   : > { %2452 = vmatpush.xpose.msk.msrb.mxu0 %vm440_vm0, %v887_v18 }
 0x171   : > { %v505_v19 = vpop.f32.mrf.mxu3 }
 0x172   : > { %v587_v20 = vsel %vm3256_vm1, %v505_v19, -inf }
 0x179   : > { %v508_v21 = vpop.f32.mrf.mxu3 }
 0x17a   : > { %v588_v22 = vsel %vm3263_vm3, %v508_v21, -inf }
 0x17b   : > { %v603_v28 = vsel %vm593_vm2, %v588_v22, -inf }
 0x181   : > { %v540_v25 = vpop.f32.mrf.mxu3 }
 0x182   : > { %v589_v26 = vsel %vm3256_vm1, %v540_v25, -inf }
 0x183   : > { %v606_v27 = vsel %vm593_vm2, %v589_v26, -inf }
 0x184   : > { %607 = vmax.xlane.f32.xlu1 %v606_v27 }
 0x189   : > { %v543_v30 = vpop.f32.mrf.mxu3 }
 0x18a   : > { %v590_v31 = vsel %vm3263_vm3, %v543_v30, -inf }
 0x18b   : > { %v609_v32 = vsel %vm593_vm2, %v590_v31, -inf }
 0x18c   : > { %610 = vmax.xlane.f32.xlu1 %v609_v32  ;;  %v473_v32 = vpop.f32.mrf.mxu2 }
 0x191   : > { %v575_v33 = vpop.f32.mrf.mxu3 }
 0x192   : > { %v591_v34 = vsel %vm3256_vm1, %v575_v33, -inf  ;;  %v586_v33 = vsel %vm3263_vm3, %v473_v32, -inf }
 0x193   : > { %v612_v35 = vsel %vm593_vm2, %v591_v34, -inf }
 0x194   : > { %613 = vmax.xlane.f32.xlu0 %v612_v35 }
 0x199   : > { %v578_v36 = vpop.f32.mrf.mxu3 }
 0x19a   : > { %v592_v37 = vsel %vm3263_vm3, %v578_v36, -inf }
 0x19b   : > { %v615_v38 = vsel %vm593_vm2, %v592_v37, -inf }
 0x19c   : > { %616 = vmax.xlane.f32.xlu0 %v615_v38 }
 0x1a5   : > { %923 = vrot.lane.b32.xlu1 %v3203_v5, %s2997_s21 }
 0x1b0   : > { %925 = vrot.lane.b32.xlu0 %v3211_v7, %s2997_s21 }
 0x1f7   : > { %v608_v39 = vpop.xlane.xlu1 %607 }
 0x1f8   : > { %v622_v40 = vsub.f32 %v589_v26, %v608_v39  ;;  %v600_v26 = vsel %vm593_vm2, %v587_v20, -inf }
 0x1fa   : > { %v634_v41 = vmul.f32 1.442695, %v622_v40 }
 0x1fc   : > { %2701 = vpow2.f32 %v634_v41 }
 0x1ff   : > { %v611_v42 = vpop.xlane.xlu1 %610 }
 0x200   : > { %v623_v43 = vsub.f32 %v590_v31, %v611_v42 }
 0x202   : > { %v2702_v44 = vpop.eup %2701  ;;  %v636_v45 = vmul.f32 1.442695, %v623_v43 }
 0x203   : > { %v654_v46 = vsel %vm593_vm2, %v2702_v44, 0.0 }
 0x204   : > { %2703 = vpow2.f32 %v636_v45  ;;  %655 = vadd.xlane.f32.xlu0 %v654_v46 }
 0x207   : > { %v614_v48 = vpop.xlane.xlu0 %613 }
 0x208   : > { %v624_v50 = vsub.f32 %v591_v34, %v614_v48  ;;  %v597_v34 = vsel %vm593_vm2, %v586_v33, -inf }
 0x20a   : > { %v2704_v51 = vpop.eup %2703  ;;  %v638_v52 = vmul.f32 1.442695, %v624_v50 }
 0x20b   : > { %v657_v53 = vsel %vm593_vm2, %v2704_v51, 0.0 }
 0x20c   : > { %2705 = vpow2.f32 %v638_v52  ;;  %658 = vadd.xlane.f32.xlu1 %v657_v53  ;;  %595 = vmax.xlane.f32.xlu0 %v594_v54 }
 0x20f   : > { %v617_v55 = vpop.xlane.xlu0 %616 }
 0x210   : > { %v625_v18 = vsub.f32 %v592_v37, %v617_v55 }
 0x212   : > { %v2706_v23 = vpop.eup %2705  ;;  %v640_v25 = vmul.f32 1.442695, %v625_v18 }
 0x213   : > { %v660_v27 = vsel %vm593_vm2, %v2706_v23, 0.0 }
 0x214   : > { %2707 = vpow2.f32 %v640_v25  ;;  %601 = vmax.xlane.f32.xlu1 %v600_v26  ;;  %661 = vadd.xlane.f32.xlu2 %v660_v27 }
 0x215   : > { %604 = vmax.xlane.f32.xlu0 %v603_v28 }
 0x217   : > { %v924_v21 = vpop.permute.xlu1 %923 }
 0x21a   : > { %v2708_v30 = vpop.eup %2707 }
 0x21b   : > { %v663_v31 = vsel %vm593_vm2, %v2708_v30, 0.0 }
 0x21c   : > { %664 = vadd.xlane.f32.xlu2 %v663_v31 }
 0x222   : > { %v926_v19 = vpop.permute.xlu0 %925 }
 0x223   : > { %2456 = vmatpush.xpose.msk.msra.mxu1 %vm440_vm0, %v926_v19 }
 0x227   : > { %2457 = vmatpush.xpose.msk.msra.mxu1 %vm440_vm0, %v924_v21 }
 0x234   : > { %884 = vrot.lane.b32.xlu2 %v3187_v1, %s2997_s21 }
 0x23c   : > { %880 = vrot.lane.b32.xlu2 %v3185_v0, %s2997_s21 }
 0x244   : > { %882 = vrot.lane.b32.xlu2 %v3191_v2, %s2997_s21 }
 0x26d   : > { %598 = vmax.xlane.f32.xlu2 %v597_v34 }
 0x277   : > { %v656_v35 = vpop.xlane.xlu0 %655 }
 0x278   : > { %2709 = vrcp.f32 %v656_v35 }
 0x27e   : > { %v2710_v36 = vpop.eup %2709 }
 0x27f   : > { %v678_v37 = vmul.f32 %v2710_v36, %v2702_v44  ;;  %v659_v38 = vpop.xlane.xlu1 %658  ;;  %v596_v39 = vpop.xlane.xlu0 %595  ;;  %v3341_v36 = vpack.i.bf16 %v3245_v14, %v3247_v15 }
 0x280   : > { %2711 = vrcp.f32 %v659_v38  ;;  %v618_v40 = vsub.f32 %v585_v49, %v596_v39 }
 0x281   : > { %2440 = vmatmul.msk.f32.vlgmr.msra.gmra.mxu0 %vm593_vm2, %v678_v37 }
 0x282   : > { %v626_v41 = vmul.f32 1.442695, %v618_v40 }
 0x284   : > { %2713 = vpow2.f32 %v626_v41 }
 0x285   : > { %841 = vrot.lane.b32.xlu2 %v3169_v60, %s2997_s21 }
 0x286   : > { %v2712_v42 = vpop.eup %2711 }
 0x287   : > { %v602_v43 = vpop.xlane.xlu1 %601  ;;  %v662_v45 = vpop.xlane.xlu2 %661  ;;  %v679_v46 = vmul.f32 %v2712_v42, %v2704_v51 }
 0x288   : > { %v620_v47 = vsub.f32 %v587_v20, %v602_v43  ;;  %2715 = vrcp.f32 %v662_v45  ;;  %v605_v48 = vpop.xlane.xlu0 %604 }
 0x289   : > { %2441 = vmatmul.msk.f32.gmra.mxu0 %vm593_vm2, %v679_v46  ;;  %v621_v52 = vsub.f32 %v588_v22, %v605_v48 }
 0x28a   : > { %v2714_v44 = vpop.eup %2713  ;;  %v630_v50 = vmul.f32 1.442695, %v620_v47 }
 0x28b   : > { %v642_v49 = vsel %vm593_vm2, %v2714_v44, 0.0  ;;  %v632_v54 = vmul.f32 1.442695, %v621_v52 }
 0x28c   : > { %2717 = vpow2.f32 %v630_v50  ;;  %643 = vadd.xlane.f32.xlu1 %v642_v49 }
 0x28d   : > { %1380 = vrot.lane.b32.xlu2 %v3171_v61, %s2998_s26 }
 0x28e   : > { %v2716_v53 = vpop.eup %2715 }
 0x28f   : > { %v665_v55 = vpop.xlane.xlu2 %664  ;;  %v680_v51 = vmul.f32 %v2716_v53, %v2706_v23 }
 0x290   : > { %2719 = vrcp.f32 %v665_v55 }
 0x291   : > { %2442 = vmatmul.msk.f32.vlgmr.msrb.gmra.mxu1 %vm593_vm2, %v680_v51  ;;  %2721 = vpow2.f32 %v632_v54 }
 0x292   : > { %v3312_v18 = vpop.eup %2717 }
 0x293   : > { %v648_v20 = vsel %vm593_vm2, %v3312_v18, 0.0 }
 0x294   : > { %649 = vadd.xlane.f32.xlu1 %v648_v20 }
 0x296   : > { %v2720_v22 = vpop.eup %2719 }
 0x297   : > { %v885_v25 = vpop.permute.xlu2 %884  ;;  %v681_v26 = vmul.f32 %v2720_v22, %v2708_v30  ;;  %v3316_v27 = vpop.eup %2721 }
 0x298   : > { %2453 = vmatpush.xpose.msk.msrb.mxu0 %vm440_vm0, %v885_v25  ;;  %v651_v23 = vsel %vm593_vm2, %v3316_v27, 0.0 }
 0x299   : > { %2443 = vmatmul.msk.f32.gmra.mxu1 %vm593_vm2, %v681_v26 }
 0x29c   : > { %652 = vadd.xlane.f32.xlu1 %v651_v23 }
 0x29f   : > { %v881_v28 = vpop.permute.xlu2 %880 }
 0x2a0   : > { %2454 = vmatmul.msk.f32.vlgmr.msrb.gmra.mxu0 %vm440_vm0, %v881_v28 }
 0x2a1   : > { %2458 = vmatmul.msk.f32.vlgmr.msra.gmra.mxu1 %vm440_vm0, %v3251_v16 }
 0x2a7   : > { %v883_v31 = vpop.permute.xlu2 %882 }
 0x2a8   : > { %2455 = vmatmul.msk.f32.gmra.mxu0 %vm440_vm0, %v883_v31 }
 0x2a9   : > { %2459 = vmatmul.msk.f32.gmra.mxu1 %vm440_vm0, %v3253_v17 }
 0x2b5   : > { %847 = vrot.lane.b32.xlu1 %v3179_v63, %s2997_s21 }
 0x2bd   : > { %843 = vrot.lane.b32.xlu1 %v3177_v62, %s2997_s21 }
 0x2c5   : > { %1382 = vrot.lane.b32.xlu1 %v3179_v63, %s2998_s26 }
 0x2cd   : > { %1378 = vrot.lane.b32.xlu1 %v3177_v62, %s2998_s26 }
 0x2e0   : > { %v599_v30 = vpop.xlane.xlu2 %598 }
 0x2e1   : > { %v619_v16 = vsub.f32 %v586_v33, %v599_v30 }
 0x2e3   : > { %v628_v19 = vmul.f32 1.442695, %v619_v16 }
 0x2e5   : > { %2723 = vpow2.f32 %v628_v19 }
 0x2e8   : > { %v842_v31 = vpop.permute.xlu2 %841 }
 0x2eb   : > { %v2724_v21 = vpop.eup %2723 }
 0x2ec   : > { %v645_v32 = vsel %vm593_vm2, %v2724_v21, 0.0 }
 0x2ed   : > { %646 = vadd.xlane.f32.xlu0 %v645_v32 }
 0x2fe   : > { %v3346_v33 = vpop.f32.mrf.mxu0 }
 0x2ff   : > { %v644_v17 = vpop.xlane.xlu1 %643 }
 0x300   : > { %2725 = vrcp.f32 %v644_v17 }
 0x301   : > { %845 = vrot.lane.b32.xlu0 %v3171_v61, %s2997_s21 }
 0x306   : > { %v2726_v34 = vpop.eup %2725  ;;  %v3348_v37 = vpop.f32.mrf.mxu0 }
 0x307   : > { %v674_v35 = vmul.f32 %v2726_v34, %v2714_v44  ;;  %v650_v38 = vpop.xlane.xlu1 %649 }
 0x309   : > { %2641 = vrot.lane.b32.xlu0 %v3341_v36, %s2997_s21  ;;  %2436 = vmatmul.msk.f32.vlgmr.msrb.gmra.mxu3 %vm593_vm2, %v674_v35 }
 0x30e   : > { %v3350_v40 = vpop.f32.mrf.mxu1 }
 0x30f   : > { %v653_v41 = vpop.xlane.xlu1 %652 }
 0x316   : > { %v3358_v45 = vpop.f32.mrf.mxu1 }
 0x31d   : > { %v913_v39 = vpop.f32.mrf.mxu0 }
 0x31e   : > { %v962_v46 = vsel %vm3256_vm1, %v913_v39, -inf  ;;  %v952_v47 = vpop.f32.mrf.mxu1 }
 0x31f   : > { %v978_v48 = vsel %vm593_vm2, %v962_v46, -inf  ;;  %v964_v44 = vsel %vm3256_vm1, %v952_v47, -inf }
 0x320   : > { %v984_v50 = vsel %vm593_vm2, %v964_v44, -inf }
 0x325   : > { %v916_v42 = vpop.f32.mrf.mxu0 }
 0x326   : > { %v3354_v43 = vsel %vm3263_vm3, %v916_v42, -inf  ;;  %v955_v52 = vpop.f32.mrf.mxu1 }
 0x327   : > { %v848_v14 = vpop.permute.xlu1 %847  ;;  %v981_v15 = vsel %vm593_vm2, %v3354_v43, -inf  ;;  %v965_v49 = vsel %vm3263_vm3, %v955_v52, -inf }
 0x328   : > { %982 = vmax.xlane.f32.xlu2 %v981_v15  ;;  %2448 = vmatpush.xpose.msk.msrb.mxu3 %vm440_vm0, %v848_v14  ;;  %v987_v53 = vsel %vm593_vm2, %v965_v49, -inf }
 0x32f   : > { %v844_v23 = vpop.permute.xlu1 %843 }
 0x333   : > { %979 = vmax.xlane.f32.xlu0 %v978_v48 }
 0x33b   : > { %985 = vmax.xlane.f32.xlu0 %v984_v50 }
 0x343   : > { %988 = vmax.xlane.f32.xlu0 %v987_v53 }
 0x357   : > { %1376 = vrot.lane.b32.xlu0 %v3169_v60, %s2998_s26 }
 0x360   : > { %v647_v54 = vpop.xlane.xlu0 %646 }
 0x361   : > { %2727 = vrcp.f32 %v647_v54 }
 0x362   : > { %2729 = vrcp.f32 %v650_v38 }
 0x363   : > { %2731 = vrcp.f32 %v653_v41 }
 0x367   : > { %v2728_v55 = vpop.eup %2727 }
 0x368   : > { %v675_v51 = vmul.f32 %v2728_v55, %v2724_v21  ;;  %v2730_v20 = vpop.eup %2729  ;;  %v1383_v21 = vpop.permute.xlu1 %1382 }
 0x369   : > { %v676_v22 = vmul.f32 %v2730_v20, %v3312_v18  ;;  %v2732_v26 = vpop.eup %2731  ;;  %v1381_v18 = vpop.permute.xlu2 %1380 }
 0x36a   : > { %2437 = vmatmul.msk.f32.gmra.mxu3 %vm593_vm2, %v675_v51  ;;  %v677_v28 = vmul.f32 %v2732_v26, %v3316_v27 }
 0x370   : > { %v1379_v26 = vpop.permute.xlu1 %1378 }
 0x372   : > { %2438 = vmatmul.msk.f32.vlgmr.msra.gmra.mxu3 %vm593_vm2, %v676_v22 }
 0x373   : > { %v846_v25 = vpop.permute.xlu0 %845 }
 0x374   : > { %2449 = vmatpush.xpose.msk.msrb.mxu3 %vm440_vm0, %v846_v25 }
 0x37a   : > { %2439 = vmatmul.msk.f32.gmra.mxu3 %vm593_vm2, %v677_v28 }
 0x37b   : > { %v2642_v30 = vpop.permute.xlu0 %2641 }
 0x37c   : > { %v2643_v16 = vunpack.i.l.bf16 %v2642_v30  ;;  %v2644_v19 = vunpack.i.h.bf16 %v2642_v30 }
 0x37e   : > { %1193 = vmatpush.msrb.mxu1 %v2643_v16 }
 0x380   : > { %1194 = vmatpush.msrb.mxu1 %v2644_v19 }
 0x382   : > { %2488 = vmatpush.xpose.msk.msra.mxu1 %vm440_vm0, %v1383_v21  ;;  %2450 = vmatmul.msk.f32.vlgmr.msrb.gmra.mxu3 %vm440_vm0, %v842_v31 }
 0x386   : > { %2489 = vmatpush.xpose.msk.msra.mxu1 %vm440_vm0, %v1381_v18 }
 0x38a   : > { %2451 = vmatmul.msk.f32.gmra.mxu3 %vm440_vm0, %v844_v23 }
 0x38c   : > { %v3406_v52 = vpop.f32.mrf.mxu3 }
 0x39b   : > { %v983_v53 = vpop.xlane.xlu2 %982 }
 0x3a6   : > { %v980_v32 = vpop.xlane.xlu0 %979 }
 0x3a7   : > { %v994_v27 = vsub.f32 %v962_v46, %v980_v32 }
 0x3a9   : > { %v1006_v17 = vmul.f32 1.442695, %v994_v27 }
 0x3ab   : > { %2733 = vpow2.f32 %v1006_v17 }
 0x3ae   : > { %v986_v34 = vpop.xlane.xlu0 %985 }
 0x3af   : > { %v996_v35 = vsub.f32 %v964_v44, %v986_v34  ;;  %v3398_v44 = vpack.i.bf16 %v3239_v12, %v3241_v13  ;;  %v995_v12 = vsub.f32 %v3354_v43, %v983_v53 }
 0x3b1   : > { %v3382_v38 = vpop.eup %2733  ;;  %v1010_v39 = vmul.f32 1.442695, %v996_v35  ;;  %v1008_v54 = vmul.f32 1.442695, %v995_v12 }
 0x3b2   : > { %v1026_v41 = vsel %vm593_vm2, %v3382_v38, 0.0 }
 0x3b3   : > { %2735 = vpow2.f32 %v1010_v39  ;;  %1027 = vadd.xlane.f32.xlu0 %v1026_v41 }
 0x3b6   : > { %v989_v42 = vpop.xlane.xlu0 %988 }
 0x3b7   : > { %v997_v14 = vsub.f32 %v965_v49, %v989_v42 }
 0x3b9   : > { %v2736_v15 = vpop.eup %2735  ;;  %v1012_v47 = vmul.f32 1.442695, %v997_v14 }
 0x3ba   : > { %v1032_v48 = vsel %vm593_vm2, %v2736_v15, 0.0 }
 0x3bb   : > { %2737 = vpow2.f32 %v1012_v47  ;;  %1033 = vadd.xlane.f32.xlu1 %v1032_v48 }
 0x3bc   : > { %2739 = vpow2.f32 %v1008_v54 }
 0x3c1   : > { %v2738_v46 = vpop.eup %2737 }
 0x3c2   : > { %v1035_v50 = vsel %vm593_vm2, %v2738_v46, 0.0  ;;  %v3421_v51 = vpop.eup %2739 }
 0x3c3   : > { %1036 = vadd.xlane.f32.xlu2 %v1035_v50  ;;  %v1029_v20 = vsel %vm593_vm2, %v3421_v51, 0.0 }
 0x3c7   : > { %1456 = vrot.lane.b32.xlu0 %v3209_v6, %s2998_s26 }
 0x3c9   : > { %v1377_v23 = vpop.permute.xlu0 %1376 }
 0x3cf   : > { %1421 = vrot.lane.b32.xlu0 %v3193_v3, %s2998_s26 }
 0x3d4   : > { %1460 = vrot.lane.b32.xlu1 %v3211_v7, %s2998_s26 }
 0x3d7   : > { %1415 = vrot.lane.b32.xlu0 %v3185_v0, %s2998_s26 }
 0x3db   : > { %2646 = vrot.lane.b32.xlu2 %v3398_v44, %s2997_s21 }
 0x3dc   : > { %1458 = vrot.lane.b32.xlu1 %v3203_v5, %s2998_s26 }
 0x3e4   : > { %1454 = vrot.lane.b32.xlu1 %v3201_v4, %s2998_s26 }
 0x3ec   : > { %1343 = vrot.lane.b32.xlu1 %v3159_v59, %s2998_s26 }
 0x3ed   : > { %v3410_v49 = vpop.f32.mrf.mxu3 }
 0x3f4   : > { %1341 = vrot.lane.b32.xlu1 %v3155_v57, %s2998_s26 }
 0x3f5   : > { %v3415_v13 = vpop.f32.mrf.mxu3 }
 0x3fc   : > { %1337 = vrot.lane.b32.xlu1 %v3153_v56, %s2998_s26 }
 0x3fd   : > { %v3419_v55 = vpop.f32.mrf.mxu3 }
 0x404   : > { %1419 = vrot.lane.b32.xlu1 %v3187_v1, %s2998_s26  ;;  %1030 = vadd.xlane.f32.xlu2 %v1029_v20 }
 0x405   : > { %v874_v43 = vpop.f32.mrf.mxu3 }
 0x406   : > { %v3429_v22 = vsel %vm3256_vm1, %v874_v43, -inf }
 0x407   : > { %v972_v25 = vsel %vm593_vm2, %v3429_v22, -inf }
 0x408   : > { %973 = vmax.xlane.f32.xlu0 %v972_v25 }
 0x40c   : > { %1417 = vrot.lane.b32.xlu1 %v3191_v2, %s2998_s26 }
 0x40d   : > { %v877_v31 = vpop.f32.mrf.mxu3 }
 0x40e   : > { %v3443_v30 = vsel %vm3263_vm3, %v877_v31, -inf }
 0x40f   : > { %v975_v19 = vsel %vm593_vm2, %v3443_v30, -inf }
 0x41c   : > { %1339 = vrot.lane.b32.xlu2 %v3157_v58, %s2998_s26 }
 0x424   : > { %808 = vrot.lane.b32.xlu2 %v3159_v59, %s2997_s21 }
 0x426   : > { %v1028_v21 = vpop.xlane.xlu0 %1027 }
 0x42c   : > { %806 = vrot.lane.b32.xlu2 %v3155_v57, %s2997_s21 }
 0x42e   : > { %v1034_v28 = vpop.xlane.xlu1 %1033 }
 0x42f   : > { %2741 = vrcp.f32 %v1034_v28 }
 0x434   : > { %802 = vrot.lane.b32.xlu2 %v3153_v56, %s2997_s21 }
 0x435   : > { %v2742_v16 = vpop.eup %2741 }
 0x436   : > { %v1052_v18 = vmul.f32 %v2742_v16, %v2736_v15  ;;  %976 = vmax.xlane.f32.xlu1 %v975_v19  ;;  %v1037_v32 = vpop.xlane.xlu2 %1036 }
 0x437   : > { %2743 = vrcp.f32 %v1037_v32  ;;  %v3491_v32 = vpack.i.bf16 %v3219_v8, %v3227_v9 }
 0x438   : > { %2466 = vmatmul.msk.f32.vlgmr.msrb.gmra.mxu1 %vm593_vm2, %v1052_v18  ;;  %2745 = vrcp.f32 %v1028_v21 }
 0x439   : > { %v1457_v47 = vpop.permute.xlu0 %1456 }
 0x43c   : > { %804 = vrot.lane.b32.xlu2 %v3157_v58, %s2997_s21 }
 0x43d   : > { %v2744_v27 = vpop.eup %2743 }
 0x43e   : > { %v2647_v17 = vpop.permute.xlu2 %2646  ;;  %v1053_v34 = vmul.f32 %v2744_v27, %v2738_v46  ;;  %v2746_v35 = vpop.eup %2745 }
 0x43f   : > { %v2648_v39 = vunpack.i.l.bf16 %v2647_v17  ;;  %v2649_v41 = vunpack.i.h.bf16 %v2647_v17  ;;  %v1050_v42 = vmul.f32 %v2746_v35, %v3382_v38 }
 0x440   : > { %2467 = vmatmul.msk.f32.gmra.mxu1 %vm593_vm2, %v1053_v34 }
 0x441   : > { %1156 = vmatpush.msra.mxu0 %v2648_v39  ;;  %v1422_v50 = vpop.permute.xlu0 %1421 }
 0x443   : > { %1157 = vmatpush.msra.mxu0 %v2649_v41 }
 0x444   : > { %2661 = vrot.lane.b32.xlu2 %v3341_v36, %s2998_s26  ;;  %2464 = vmatmul.msk.f32.vlgmr.msra.gmra.mxu0 %vm593_vm2, %v1050_v42 }
 0x446   : > { %v1461_v14 = vpop.permute.xlu1 %1460 }
 0x447   : > { %2496 = vmatpush.xpose.msk.msrb.mxu1 %vm440_vm0, %v1461_v14 }
 0x448   : > { %2490 = vmatmul.msk.f32.vlgmr.msra.gmra.mxu1 %vm440_vm0, %v1377_v23 }
 0x449   : > { %v1416_v53 = vpop.permute.xlu0 %1415 }
 0x44c   : > { %1813 = vrot.lane.b32.xlu2 %v3159_v59, %s2999_s10 }
 0x44e   : > { %v1459_v15 = vpop.permute.xlu1 %1458 }
 0x44f   : > { %2497 = vmatpush.xpose.msk.msrb.mxu1 %vm440_vm0, %v1459_v15 }
 0x450   : > { %2491 = vmatmul.msk.f32.gmra.mxu1 %vm440_vm0, %v1379_v26 }
 0x454   : > { %1887 = vrot.lane.b32.xlu2 %v3191_v2, %s2999_s10 }
 0x456   : > { %v1455_v38 = vpop.permute.xlu1 %1454 }
 0x458   : > { %2498 = vmatmul.msk.f32.vlgmr.msrb.gmra.mxu1 %vm440_vm0, %v1455_v38 }
 0x45e   : > { %v1344_v48 = vpop.permute.xlu1 %1343 }
 0x45f   : > { %2484 = vmatpush.xpose.msk.msrb.mxu0 %vm440_vm0, %v1344_v48 }
 0x460   : > { %2499 = vmatmul.msk.f32.gmra.mxu1 %vm440_vm0, %v1457_v47 }
 0x466   : > { %v1342_v46 = vpop.permute.xlu1 %1341 }
 0x467   : > { %2485 = vmatpush.xpose.msk.msrb.mxu0 %vm440_vm0, %v1342_v46 }
 0x46b   : > { %2492 = vmatpush.xpose.msk.msra.mxu0 %vm440_vm0, %v1422_v50 }
 0x46e   : > { %v1338_v59 = vpop.permute.xlu1 %1337 }
 0x476   : > { %v1420_v12 = vpop.permute.xlu1 %1419 }
 0x477   : > { %v1031_v54 = vpop.xlane.xlu2 %1030  ;;  %2493 = vmatpush.xpose.msk.msra.mxu0 %vm440_vm0, %v1420_v12 }
 0x478   : > { %2747 = vrcp.f32 %v1031_v54  ;;  %v800_v54 = vld [vmem:[#allocation7 + $0x10] sm:$0xff] }
 0x47b   : > { %v974_v2 = vpop.xlane.xlu0 %973 }
 0x47c   : > { %v992_v20 = vsub.f32 %v3429_v22, %v974_v2 }
 0x47e   : > { %v2748_v43 = vpop.eup %2747  ;;  %v1002_v25 = vmul.f32 1.442695, %v992_v20  ;;  %v1418_v18 = vpop.permute.xlu1 %1417 }
 0x47f   : > { %v1340_v26 = vpop.permute.xlu2 %1339  ;;  %v1051_v23 = vmul.f32 %v2748_v43, %v3421_v51  ;;  %v3483_v51 = vpack.i.bf16 %v3233_v10, %v3235_v11 }
 0x480   : > { %2749 = vpow2.f32 %v1002_v25  ;;  %v799_v25 = vld [vmem:[#allocation7 + $0x8] sm:$0xff] }
 0x481   : > { %2465 = vmatmul.msk.f32.gmra.mxu0 %vm593_vm2, %v1051_v23 }
 0x486   : > { %v2750_v28 = vpop.eup %2749 }
 0x487   : > { %v809_v31 = vpop.permute.xlu2 %808  ;;  %v1020_v16 = vsel %vm593_vm2, %v2750_v28, 0.0 }
 0x488   : > { %2444 = vmatpush.xpose.msk.msra.mxu2 %vm440_vm0, %v809_v31  ;;  %1021 = vadd.xlane.f32.xlu0 %v1020_v16  ;;  %v798_v31 = vld [vmem:[#allocation7] sm:$0xff] }
 0x489   : > { %2486 = vmatmul.msk.f32.vlgmr.msrb.gmra.mxu0 %vm440_vm0, %v1338_v59 }
 0x48f   : > { %v807_v19 = vpop.permute.xlu2 %806 }
 0x490   : > { %2445 = vmatpush.xpose.msk.msra.mxu2 %vm440_vm0, %v807_v19 }
 0x491   : > { %2487 = vmatmul.msk.f32.gmra.mxu0 %vm440_vm0, %v1340_v26 }
 0x497   : > { %v803_v22 = vpop.permute.xlu2 %802 }
 0x498   : > { %2446 = vmatmul.msk.f32.vlgmr.msra.gmra.mxu2 %vm440_vm0, %v803_v22 }
 0x499   : > { %2494 = vmatmul.msk.f32.vlgmr.msra.gmra.mxu0 %vm440_vm0, %v1416_v53  ;;  %v801_v53 = vld [vmem:[#allocation7 + $0x18] sm:$0xff] }
 0x49c   : > { %2651 = vrot.lane.b32.xlu0 %v3483_v51, %s2997_s21 }
 0x49f   : > { %v805_v21 = vpop.permute.xlu2 %804 }
 0x4a0   : > { %2447 = vmatmul.msk.f32.gmra.mxu2 %vm440_vm0, %v805_v21 }
 0x4a1   : > { %2495 = vmatmul.msk.f32.gmra.mxu0 %vm440_vm0, %v1418_v18 }
 0x4a4   : > { %2666 = vrot.lane.b32.xlu0 %v3491_v32, %s2998_s26 }
 0x4a7   : > { %v2662_v46 = vpop.permute.xlu2 %2661 }
 0x4a9   : > { %v977_v27 = vpop.xlane.xlu1 %976 }
 0x4aa   : > { %v993_v10 = vsub.f32 %v3443_v30, %v977_v27 }
 0x4ac   : > { %v1004_v11 = vmul.f32 1.442695, %v993_v10  ;;  %1891 = vrot.lane.b32.xlu0 %v3193_v3, %s2999_s10 }
 0x4ae   : > { %2751 = vpow2.f32 %v1004_v11 }
 0x4af   : > { %v1814_v22 = vpop.permute.xlu2 %1813 }
 0x4b4   : > { %v3498_v17 = vpop.eup %2751  ;;  %1811 = vrot.lane.b32.xlu0 %v3155_v57, %s2999_s10 }
 0x4b5   : > { %v3502_v34 = vpop.f32.mrf.mxu1  ;;  %v1023_v8 = vsel %vm593_vm2, %v3498_v17, 0.0 }
 0x4b6   : > { %1024 = vadd.xlane.f32.xlu1 %v1023_v8 }
 0x4bc   : > { %1889 = vrot.lane.b32.xlu0 %v3187_v1, %s2999_s10 }
 0x4bd   : > { %v3508_v9 = vpop.f32.mrf.mxu1 }
 0x4c1   : > { %v3522_v57 = vpop.f32.mrf.mxu0 }
 0x4c5   : > { %v1409_v30 = vpop.f32.mrf.mxu1 }
 0x4c6   : > { %v3512_v3 = vsel %vm3256_vm1, %v1409_v30, -inf }
 0x4c7   : > { %v1507_v35 = vsel %vm593_vm2, %v3512_v3, -inf }
 0x4c8   : > { %1508 = vmax.xlane.f32.xlu2 %v1507_v35 }
 0x4cd   : > { %v1412_v12 = vpop.f32.mrf.mxu1 }
 0x4ce   : > { %v3541_v2 = vsel %vm3263_vm3, %v1412_v12, -inf }
 0x4cf   : > { %2656 = vrot.lane.b32.xlu1 %v3483_v51, %s2998_s26  ;;  %v1510_v19 = vsel %vm593_vm2, %v3541_v2, -inf }
 0x4d5   : > { %v1487_v11 = vpop.f32.mrf.mxu1 }
 0x4d6   : > { %v3564_v8 = vsel %vm3256_vm1, %v1487_v11, -inf }
 0x4d7   : > { %1807 = vrot.lane.b32.xlu1 %v3153_v56, %s2999_s10  ;;  %v1519_v35 = vsel %vm593_vm2, %v3564_v8, -inf }
 0x4df   : > { %1809 = vrot.lane.b32.xlu1 %v3157_v58, %s2999_s10 }
 0x4fb   : > { %v1022_v39 = vpop.xlane.xlu0 %1021 }
 0x4fc   : > { %2753 = vrcp.f32 %v1022_v39  ;;  %v1490_v39 = vpop.f32.mrf.mxu1 }
 0x4fe   : > { %v3524_v1 = vpop.f32.mrf.mxu0 }
 0x502   : > { %v2754_v38 = vpop.eup %2753 }
 0x503   : > { %v1048_v59 = vmul.f32 %v2754_v38, %v2750_v28 }
 0x506   : > { %v1370_v41 = vpop.f32.mrf.mxu0 }
 0x507   : > { %v3528_v42 = vsel %vm3256_vm1, %v1370_v41, -inf  ;;  %v3571_v41 = vsel %vm3263_vm3, %v1490_v39, -inf }
 0x508   : > { %v1501_v14 = vsel %vm593_vm2, %v3528_v42, -inf }
 0x509   : > { %1502 = vmax.xlane.f32.xlu0 %v1501_v14 }
 0x50e   : > { %v1373_v15 = vpop.f32.mrf.mxu0  ;;  %v2652_v56 = vpop.permute.xlu0 %2651 }
 0x50f   : > { %v3534_v58 = vsel %vm3263_vm3, %v1373_v15, -inf  ;;  %v2653_v47 = vunpack.i.l.bf16 %v2652_v56  ;;  %v2654_v50 = vunpack.i.h.bf16 %v2652_v56  ;;  %v1522_v15 = vsel %vm593_vm2, %v3571_v41, -inf }
 0x510   : > { %v1504_v48 = vsel %vm593_vm2, %v3534_v58, -inf }
 0x511   : > { %1505 = vmax.xlane.f32.xlu1 %v1504_v48  ;;  %1119 = vmatpush.msra.mxu3 %v2653_v47 }
 0x513   : > { %1120 = vmatpush.msra.mxu3 %v2654_v50  ;;  %v2663_v50 = vunpack.i.l.bf16 %v2662_v46 }
 0x514   : > { %2462 = vmatmul.msk.f32.vlgmr.msra.gmra.mxu3 %vm593_vm2, %v1048_v59  ;;  %v2664_v59 = vunpack.i.h.bf16 %v2662_v46 }
 0x515   : > { %1308 = vmatpush.msrb.mxu3 %v801_v53 }
 0x516   : > { %v1448_v20 = vpop.f32.mrf.mxu0  ;;  %v2667_v43 = vpop.permute.xlu0 %2666 }
 0x517   : > { %v3545_v26 = vsel %vm3256_vm1, %v1448_v20, -inf  ;;  %v2668_v23 = vunpack.i.l.bf16 %v2667_v43  ;;  %1309 = vmatpush.msrb.mxu3 %v800_v54  ;;  %v2669_v16 = vunpack.i.h.bf16 %v2667_v43 }
 0x518   : > { %v1513_v28 = vsel %vm593_vm2, %v3545_v26, -inf }
 0x519   : > { %1310 = vmatpush.msrb.mxu3 %v799_v25  ;;  %1615 = vmatpush.msrb.mxu0 %v2668_v23 }
 0x51a   : > { %1514 = vmax.xlane.f32.xlu2 %v1513_v28  ;;  %1511 = vmax.xlane.f32.xlu1 %v1510_v19 }
 0x51b   : > { %1311 = vmatpush.msrb.mxu3 %v798_v31  ;;  %1616 = vmatpush.msrb.mxu0 %v2669_v16 }
 0x51d   : > { %2516 = vmatpush.xpose.msk.msra.mxu3 %vm440_vm0, %v1814_v22  ;;  %1885 = vrot.lane.b32.xlu0 %v3185_v0, %s2999_s10 }
 0x51e   : > { %v1451_v21 = vpop.f32.mrf.mxu0  ;;  %v3554_v18 = vpop.permute.xlu0 %1891 }
 0x51f   : > { %v3558_v27 = vsel %vm3263_vm3, %v1451_v21, -inf }
 0x520   : > { %v1516_v10 = vsel %vm593_vm2, %v3558_v27, -inf }
 0x522   : > { %1517 = vmax.xlane.f32.xlu1 %v1516_v10 }
 0x526   : > { %v1812_v30 = vpop.permute.xlu0 %1811 }
 0x527   : > { %2517 = vmatpush.xpose.msk.msra.mxu3 %vm440_vm0, %v1812_v30 }
 0x529   : > { %v1025_v0 = vpop.xlane.xlu1 %1024 }
 0x52a   : > { %2755 = vrcp.f32 %v1025_v0  ;;  %1520 = vmax.xlane.f32.xlu1 %v1519_v35 }
 0x530   : > { %v2756_v14 = vpop.eup %2755 }
 0x531   : > { %v1049_v56 = vmul.f32 %v2756_v14, %v3498_v17  ;;  %v3597_v17 = vpop.permute.xlu2 %1887 }
 0x532   : > { %1523 = vmax.xlane.f32.xlu1 %v1522_v15 }
 0x533   : > { %2463 = vmatmul.msk.f32.gmra.mxu3 %vm593_vm2, %v1049_v56 }
 0x53b   : > { %2476 = vmatmul.msk.f32.vlgmr.msrb.gmra.mxu3 %vm440_vm0, %v3406_v52 }
 0x541   : > { %v2657_v38 = vpop.permute.xlu1 %2656 }
 0x542   : > { %v2658_v47 = vunpack.i.l.bf16 %v2657_v38  ;;  %v2659_v48 = vunpack.i.h.bf16 %v2657_v38 }
 0x543   : > { %2477 = vmatmul.msk.f32.gmra.mxu3 %vm440_vm0, %v3410_v49  ;;  %v3595_v49 = vpop.permute.xlu0 %1889 }
 0x544   : > { %1650 = vmatpush.msra.mxu1 %v2658_v47 }
 0x546   : > { %1651 = vmatpush.msra.mxu1 %v2659_v48 }
 0x548   : > { %1720 = vmatpush.msrb.mxu1 %v2663_v50 }
 0x549   : > { %v1808_v52 = vpop.permute.xlu1 %1807 }
 0x54a   : > { %1721 = vmatpush.msrb.mxu1 %v2664_v59 }
 0x54b   : > { %2671 = vrot.lane.b32.xlu1 %v3398_v44, %s2998_s26  ;;  %2478 = vmatmul.msk.f32.gmra.mxu3 %vm440_vm0, %v3415_v13 }
 0x551   : > { %v1810_v13 = vpop.permute.xlu1 %1809 }
 0x553   : > { %2479 = vmatmul.msk.f32.gmra.mxu3 %vm440_vm0, %v3419_v55 }
 0x55b   : > { %2480 = vmatmul.msk.f32.gmra.mxu3 %vm440_vm0, %v3346_v33 }
 0x563   : > { %2481 = vmatmul.msk.f32.gmra.mxu3 %vm440_vm0, %v3348_v37  ;;  %v1509_v37 = vpop.xlane.xlu2 %1508 }
 0x56b   : > { %2482 = vmatmul.msk.f32.gmra.mxu3 %vm440_vm0, %v3350_v40 }
 0x573   : > { %2483 = vmatmul.msk.f32.gmra.mxu3 %vm440_vm0, %v3358_v45  ;;  %v1527_v45 = vsub.f32 %v3512_v3, %v1509_v37 }
 0x575   : > { %v1537_v43 = vmul.f32 1.442695, %v1527_v45 }
 0x57b   : > { %2518 = vmatmul.msk.f32.vlgmr.msra.gmra.mxu3 %vm440_vm0, %v1808_v52 }
 0x57c   : > { %v1503_v55 = vpop.xlane.xlu0 %1502 }
 0x57d   : > { %v1525_v33 = vsub.f32 %v3528_v42, %v1503_v55 }
 0x57f   : > { %v1533_v46 = vmul.f32 1.442695, %v1525_v33  ;;  %v835_v33 = vpop.f32.mrf.mxu2 }
 0x581   : > { %2757 = vpow2.f32 %v1533_v46 }
 0x583   : > { %2519 = vmatmul.msk.f32.gmra.mxu3 %vm440_vm0, %v1810_v13 }
 0x584   : > { %v1506_v40 = vpop.xlane.xlu1 %1505 }
 0x585   : > { %v1526_v53 = vsub.f32 %v3534_v58, %v1506_v40 }
 0x587   : > { %v3603_v12 = vpop.eup %2757  ;;  %v1535_v54 = vmul.f32 1.442695, %v1526_v53 }
 0x588   : > { %v1549_v20 = vsel %vm593_vm2, %v3603_v12, 0.0 }
 0x589   : > { %2759 = vpow2.f32 %v1535_v54  ;;  %1550 = vadd.xlane.f32.xlu1 %v1549_v20 }
 0x58a   : > { %2761 = vpow2.f32 %v1537_v43 }
 0x58d   : > { %v1515_v42 = vpop.xlane.xlu2 %1514  ;;  %v1512_v25 = vpop.xlane.xlu1 %1511 }
 0x58e   : > { %v1529_v23 = vsub.f32 %v3545_v26, %v1515_v42  ;;  %v1528_v58 = vsub.f32 %v3541_v2, %v1512_v25 }
 0x58f   : > { %v3609_v28 = vpop.eup %2759  ;;  %v3670_v20 = vpop.permute.xlu0 %1885 }
 0x590   : > { %v1541_v31 = vmul.f32 1.442695, %v1529_v23  ;;  %v1552_v3 = vsel %vm593_vm2, %v3609_v28, 0.0  ;;  %v1539_v16 = vmul.f32 1.442695, %v1528_v58  ;;  %v3614_v19 = vpop.eup %2761 }
 0x591   : > { %1553 = vadd.xlane.f32.xlu2 %v1552_v3  ;;  %v1555_v26 = vsel %vm593_vm2, %v3614_v19, 0.0 }
 0x592   : > { %2763 = vpow2.f32 %v1541_v31 }
 0x593   : > { %2765 = vpow2.f32 %v1539_v16 }
 0x595   : > { %v1518_v22 = vpop.xlane.xlu1 %1517 }
 0x596   : > { %v1530_v56 = vsub.f32 %v3558_v27, %v1518_v22 }
 0x597   : > { %v3645_v59 = vpop.f32.mrf.mxu3 }
 0x598   : > { %v3616_v21 = vpop.eup %2763  ;;  %v1543_v47 = vmul.f32 1.442695, %v1530_v56 }
 0x599   : > { %1556 = vadd.xlane.f32.xlu2 %v1555_v26  ;;  %v1561_v2 = vsel %vm593_vm2, %v3616_v21, 0.0  ;;  %v3622_v10 = vpop.eup %2765 }
 0x59a   : > { %1562 = vadd.xlane.f32.xlu0 %v1561_v2  ;;  %v1558_v30 = vsel %vm593_vm2, %v3622_v10, 0.0 }
 0x59d   : > { %v1521_v11 = vpop.xlane.xlu1 %1520 }
 0x5a1   : > { %1559 = vadd.xlane.f32.xlu2 %v1558_v30 }
 0x5a2   : > { %1930 = vrot.lane.b32.xlu1 %v3211_v7, %s2999_s10 }
 0x5a5   : > { %v1524_v0 = vpop.xlane.xlu1 %1523 }
 0x5a6   : > { %v1532_v35 = vsub.f32 %v3571_v41, %v1524_v0 }
 0x5a8   : > { %v1547_v39 = vmul.f32 1.442695, %v1532_v35 }
 0x5aa   : > { %2767 = vpow2.f32 %v1547_v39 }
 0x5ab   : > { %2769 = vpow2.f32 %v1543_v47 }
 0x5b0   : > { %v3629_v14 = vpop.eup %2767 }
 0x5b1   : > { %v1570_v15 = vsel %vm593_vm2, %v3629_v14, 0.0  ;;  %v3638_v41 = vpop.eup %2769 }
 0x5b2   : > { %1571 = vadd.xlane.f32.xlu0 %v1570_v15  ;;  %v1564_v50 = vsel %vm593_vm2, %v3638_v41, 0.0 }
 0x5b6   : > { %v3649_v13 = vpop.f32.mrf.mxu3 }
 0x5b9   : > { %1928 = vrot.lane.b32.xlu2 %v3203_v5, %s2999_s10  ;;  %v1531_v5 = vsub.f32 %v3564_v8, %v1521_v11  ;;  %v838_v11 = vpop.f32.mrf.mxu2 }
 0x5bb   : > { %v1545_v27 = vmul.f32 1.442695, %v1531_v5 }
 0x5bd   : > { %v2672_v38 = vpop.permute.xlu1 %2671  ;;  %2771 = vpow2.f32 %v1545_v27 }
 0x5be   : > { %v2673_v48 = vunpack.i.l.bf16 %v2672_v38  ;;  %v2674_v7 = vunpack.i.h.bf16 %v2672_v38  ;;  %v3653_v55 = vpop.f32.mrf.mxu3 }
 0x5c0   : > { %1685 = vmatpush.msra.mxu0 %v2673_v48 }
 0x5c2   : > { %1686 = vmatpush.msra.mxu0 %v2674_v7 }
 0x5c3   : > { %v3647_v52 = vpop.eup %2771 }
 0x5c6   : > { %1924 = vrot.lane.b32.xlu0 %v3201_v4, %s2999_s10  ;;  %v1567_v4 = vsel %vm593_vm2, %v3647_v52, 0.0  ;;  %v3659_v8 = vpop.f32.mrf.mxu3 }
 0x5cc   : > { %1565 = vadd.xlane.f32.xlu1 %v1564_v50 }
 0x5ce   : > { %1846 = vrot.lane.b32.xlu0 %v3169_v60, %s2999_s10  ;;  %v3657_v60 = vsel %vm3256_vm1, %v835_v33, -inf  ;;  %v3665_v40 = vpop.f32.mrf.mxu3 }
 0x5cf   : > { %v966_v46 = vsel %vm593_vm2, %v3657_v60, -inf }
 0x5d6   : > { %v3673_v43 = vpop.f32.mrf.mxu3 }
 0x5e2   : > { %1568 = vadd.xlane.f32.xlu2 %v1567_v4 }
 0x5f8   : > { %967 = vmax.xlane.f32.xlu0 %v966_v46 }
 0x5fa   : > { %1852 = vrot.lane.b32.xlu2 %v3179_v63, %s2999_s10 }
 0x5fc   : > { %v1551_v37 = vpop.xlane.xlu1 %1550 }
 0x5fd   : > { %2773 = vrcp.f32 %v1551_v37 }
 0x602   : > { %1926 = vrot.lane.b32.xlu2 %v3209_v6, %s2999_s10  ;;  %v3679_v6 = vpop.f32.mrf.mxu3 }
 0x603   : > { %v2774_v53 = vpop.eup %2773 }
 0x604   : > { %v1581_v45 = vmul.f32 %v2774_v53, %v3603_v12  ;;  %v1554_v54 = vpop.xlane.xlu2 %1553 }
 0x605   : > { %2775 = vrcp.f32 %v1554_v54 }
 0x606   : > { %2500 = vmatmul.msk.f32.vlgmr.msrb.gmra.mxu0 %vm593_vm2, %v1581_v45 }
 0x60a   : > { %1850 = vrot.lane.b32.xlu2 %v3171_v61, %s2999_s10 }
 0x60b   : > { %v2776_v63 = vpop.eup %2775 }
 0x60c   : > { %v1557_v42 = vpop.xlane.xlu2 %1556  ;;  %v1582_v25 = vmul.f32 %v2776_v63, %v3609_v28 }
 0x60d   : > { %v1563_v23 = vpop.xlane.xlu0 %1562  ;;  %2777 = vrcp.f32 %v1557_v42 }
 0x60e   : > { %2779 = vrcp.f32 %v1563_v23  ;;  %2501 = vmatmul.msk.f32.gmra.mxu0 %vm593_vm2, %v1582_v25 }
 0x612   : > { %1848 = vrot.lane.b32.xlu2 %v3177_v62, %s2999_s10  ;;  %v3692_v62 = vpop.f32.mrf.mxu3 }
 0x613   : > { %v2778_v12 = vpop.eup %2777 }
 0x614   : > { %v2780_v58 = vpop.eup %2779  ;;  %v1583_v31 = vmul.f32 %v2778_v12, %v3614_v19  ;;  %v1560_v3 = vpop.xlane.xlu2 %1559 }
 0x615   : > { %v1931_v61 = vpop.permute.xlu1 %1930  ;;  %v1585_v16 = vmul.f32 %v2780_v58, %v3616_v21  ;;  %2781 = vrcp.f32 %v1560_v3 }
 0x616   : > { %2528 = vmatpush.xpose.msk.msrb.mxu3 %vm440_vm0, %v1931_v61  ;;  %2502 = vmatmul.msk.f32.vlgmr.msra.gmra.mxu1 %vm593_vm2, %v1583_v31 }
 0x617   : > { %2504 = vmatmul.msk.f32.vlgmr.msra.gmra.mxu0 %vm593_vm2, %v1585_v16  ;;  %2524 = vmatpush.xpose.msk.msra.mxu1 %vm440_vm0, %v3554_v18  ;;  %v959_v18 = vsel %vm3263_vm3, %v838_v11, -inf }
 0x618   : > { %v969_v0 = vsel %vm593_vm2, %v959_v18, -inf }
 0x61a   : > { %v3697_v21 = vpop.f32.mrf.mxu3 }
 0x61b   : > { %v2782_v28 = vpop.eup %2781  ;;  %2525 = vmatpush.xpose.msk.msra.mxu1 %vm440_vm0, %v3595_v49 }
 0x61c   : > { %v1929_v19 = vpop.permute.xlu2 %1928  ;;  %v1584_v22 = vmul.f32 %v2782_v28, %v3622_v10 }
 0x61d   : > { %2529 = vmatpush.xpose.msk.msrb.mxu3 %vm440_vm0, %v1929_v19 }
 0x61e   : > { %2503 = vmatmul.msk.f32.gmra.mxu1 %vm593_vm2, %v1584_v22 }
 0x622   : > { %v3699_v26 = vpop.f32.mrf.mxu3 }
 0x625   : > { %v1572_v2 = vpop.xlane.xlu0 %1571 }
 0x62a   : > { %v1840_v49 = vpop.f32.mrf.mxu3 }
 0x62b   : > { %v3707_v10 = vsel %vm3256_vm1, %v1840_v49, -inf }
 0x62c   : > { %v1971_v39 = vsel %vm593_vm2, %v3707_v10, -inf }
 0x632   : > { %v1843_v15 = vpop.f32.mrf.mxu3 }
 0x633   : > { %v1964_v38 = vsel %vm3263_vm3, %v1843_v15, -inf }
 0x634   : > { %v1974_v48 = vsel %vm593_vm2, %v1964_v38, -inf }
 0x638   : > { %v1925_v30 = vpop.permute.xlu0 %1924 }
 0x639   : > { %2530 = vmatmul.msk.f32.vlgmr.msrb.gmra.mxu3 %vm440_vm0, %v1925_v30 }
 0x63b   : > { %970 = vmax.xlane.f32.xlu2 %v969_v0 }
 0x63f   : > { %v1566_v35 = vpop.xlane.xlu1 %1565 }
 0x640   : > { %2783 = vrcp.f32 %v1566_v35  ;;  %v1847_v33 = vpop.permute.xlu0 %1846 }
 0x643   : > { %1972 = vmax.xlane.f32.xlu2 %v1971_v39 }
 0x646   : > { %v2784_v56 = vpop.eup %2783 }
 0x647   : > { %v1586_v47 = vmul.f32 %v2784_v56, %v3638_v41 }
 0x649   : > { %2505 = vmatmul.msk.f32.gmra.mxu0 %vm593_vm2, %v1586_v47 }
 0x64b   : > { %1975 = vmax.xlane.f32.xlu2 %v1974_v48 }
 0x655   : > { %v1569_v7 = vpop.xlane.xlu2 %1568 }
 0x656   : > { %2785 = vrcp.f32 %v1569_v7 }
 0x657   : > { %2787 = vrcp.f32 %v1572_v2 }
 0x65c   : > { %v2786_v50 = vpop.eup %2785 }
 0x65d   : > { %v1587_v5 = vmul.f32 %v2786_v50, %v3647_v52  ;;  %v1853_v27 = vpop.permute.xlu2 %1852  ;;  %v2788_v4 = vpop.eup %2787 }
 0x65e   : > { %2520 = vmatpush.xpose.msk.msrb.mxu0 %vm440_vm0, %v1853_v27  ;;  %v1588_v41 = vmul.f32 %v2788_v4, %v3629_v14 }
 0x65f   : > { %2506 = vmatmul.msk.f32.vlgmr.msrb.gmra.mxu1 %vm593_vm2, %v1587_v5 }
 0x665   : > { %v1927_v46 = vpop.permute.xlu2 %1926 }
 0x666   : > { %2531 = vmatmul.msk.f32.gmra.mxu3 %vm440_vm0, %v1927_v46 }
 0x667   : > { %2507 = vmatmul.msk.f32.gmra.mxu1 %vm593_vm2, %v1588_v41 }
 0x66b   : > { %v968_v37 = vpop.xlane.xlu0 %967 }
 0x66c   : > { %v990_v53 = vsub.f32 %v3657_v60, %v968_v37 }
 0x66d   : > { %v1851_v45 = vpop.permute.xlu2 %1850 }
 0x66e   : > { %v998_v54 = vmul.f32 1.442695, %v990_v53  ;;  %2521 = vmatpush.xpose.msk.msrb.mxu0 %vm440_vm0, %v1851_v45 }
 0x66f   : > { %2526 = vmatmul.msk.f32.vlgmr.msra.gmra.mxu1 %vm440_vm0, %v3670_v20 }
 0x670   : > { %2789 = vpow2.f32 %v998_v54 }
 0x671   : > { %2522 = vmatmul.msk.f32.vlgmr.msrb.gmra.mxu0 %vm440_vm0, %v1847_v33 }
 0x675   : > { %v1849_v63 = vpop.permute.xlu2 %1848 }
 0x676   : > { %v3727_v52 = vpop.eup %2789 }
 0x677   : > { %2527 = vmatmul.msk.f32.gmra.mxu1 %vm440_vm0, %v3597_v17  ;;  %v1014_v14 = vsel %vm593_vm2, %v3727_v52, 0.0 }
 0x678   : > { %1015 = vadd.xlane.f32.xlu1 %v1014_v14 }
 0x679   : > { %2523 = vmatmul.msk.f32.gmra.mxu0 %vm440_vm0, %v1849_v63 }
 0x683   : > { %v3745_v19 = vpop.f32.mrf.mxu0 }
 0x68b   : > { %v3751_v11 = vpop.f32.mrf.mxu0 }
 0x691   : > { %2676 = vrot.lane.b32.xlu1 %v3491_v32, %s2997_s21  ;;  %s2939_s21 = scalar_lea.hbm %s3945_s4, 128 }
 0x692   : > { %p2941_p9 = scmp.lt.s32.totalorder %s2939_s21, %s2935_s13 }
 0x693   : > { %v3747_v22 = vpop.f32.mrf.mxu1 }
 0x694   : > { %v3757_v49 = vpop.f32.mrf.mxu0  ;;  %p2942_p2 = por %p2941_p9, %p2940_p11 }
 0x696   : > { %p2943_p10 = pnand %p2942_p2, %p2938_p8 }
 0x6ae   : > { %v971_v60 = vpop.xlane.xlu2 %970 }
 0x6af   : > { %v991_v20 = vsub.f32 %v959_v18, %v971_v60  ;;  %v3753_v18 = vpop.f32.mrf.mxu1 }
 0x6b1   : > { %v1000_v42 = vmul.f32 1.442695, %v991_v20 }
 0x6b3   : > { %2791 = vpow2.f32 %v1000_v42 }
 0x6b6   : > { %v1973_v25 = vpop.xlane.xlu2 %1972 }
 0x6b7   : > { %v1995_v47 = vsub.f32 %v3707_v10, %v1973_v25 }
 0x6b9   : > { %v3736_v23 = vpop.eup %2791  ;;  %v2003_v50 = vmul.f32 1.442695, %v1995_v47 }
 0x6ba   : > { %v1017_v17 = vsel %vm593_vm2, %v3736_v23, 0.0 }
 0x6bb   : > { %1018 = vadd.xlane.f32.xlu1 %v1017_v17 }
 0x6bc   : > { %v1957_v12 = vpop.f32.mrf.mxu3 }
 0x6bd   : > { %v1969_v58 = vsel %vm3256_vm1, %v1957_v12, -inf }
 0x6be   : > { %v1976_v31 = vpop.xlane.xlu2 %1975  ;;  %v1989_v3 = vsel %vm593_vm2, %v1969_v58, -inf }
 0x6bf   : > { %v1996_v61 = vsub.f32 %v1964_v38, %v1976_v31  ;;  %1990 = vmax.xlane.f32.xlu0 %v1989_v3 }
 0x6c1   : > { %v2005_v16 = vmul.f32 1.442695, %v1996_v61 }
 0x6c3   : > { %2793 = vpow2.f32 %v2005_v16 }
 0x6c4   : > { %2795 = vpow2.f32 %v2003_v50 }
 0x6c6   : > { %v3761_v35 = vpop.f32.mrf.mxu0 }
 0x6c9   : > { %v3743_v28 = vpop.eup %2793 }
 0x6ca   : > { %v2022_v2 = vsel %vm593_vm2, %v3743_v28, 0.0  ;;  %v3784_v53 = vpop.eup %2795 }
 0x6cb   : > { %2023 = vadd.xlane.f32.xlu1 %v2022_v2  ;;  %v2019_v54 = vsel %vm593_vm2, %v3784_v53, 0.0  ;;  %v1206_v2 = vld [vmem:[#allocation7 + $0x38] sm:$0xff] }
 0x6dc   : > { %v3755_v30 = vpop.f32.mrf.mxu1 }
 0x6e4   : > { %v3759_v0 = vpop.f32.mrf.mxu1 }
 0x6e9   : > { %v1960_v24 = vpop.f32.mrf.mxu3 }
 0x6ea   : > { %v1970_v41 = vsel %vm3263_vm3, %v1960_v24, -inf }
 0x6eb   : > { %v1016_v37 = vpop.xlane.xlu1 %1015  ;;  %v1992_v45 = vsel %vm593_vm2, %v1970_v41, -inf }
 0x6ec   : > { %v1918_v39 = vpop.f32.mrf.mxu1  ;;  %2797 = vrcp.f32 %v1016_v37 }
 0x6ed   : > { %v1967_v15 = vsel %vm3256_vm1, %v1918_v39, -inf }
 0x6ee   : > { %v1879_v56 = vpop.f32.mrf.mxu0  ;;  %v1983_v38 = vsel %vm593_vm2, %v1967_v15, -inf }
 0x6ef   : > { %v3769_v48 = vsel %vm3256_vm1, %v1879_v56, -inf  ;;  %1984 = vmax.xlane.f32.xlu0 %v1983_v38 }
 0x6f0   : > { %v1977_v7 = vsel %vm593_vm2, %v3769_v48, -inf }
 0x6f1   : > { %1978 = vmax.xlane.f32.xlu2 %v1977_v7  ;;  %v1203_v7 = vld [vmem:[#allocation7 + $0x20] sm:$0xff] }
 0x6f2   : > { %v2798_v63 = vpop.eup %2797 }
 0x6f3   : > { %v1046_v42 = vmul.f32 %v2798_v63, %v3727_v52 }
 0x6f4   : > { %v1921_v5 = vpop.f32.mrf.mxu1 }
 0x6f5   : > { %v1968_v27 = vsel %vm3263_vm3, %v1921_v5, -inf }
 0x6f6   : > { %v1882_v4 = vpop.f32.mrf.mxu0  ;;  %v1986_v33 = vsel %vm593_vm2, %v1968_v27, -inf }
 0x6f7   : > { %v3778_v10 = vsel %vm3263_vm3, %v1882_v4, -inf  ;;  %1987 = vmax.xlane.f32.xlu0 %v1986_v33 }
 0x6f8   : > { %v1980_v46 = vsel %vm593_vm2, %v3778_v10, -inf }
 0x6f9   : > { %1981 = vmax.xlane.f32.xlu2 %v1980_v46 }
 0x6ff   : > { %1993 = vmax.xlane.f32.xlu0 %v1992_v45 }
 0x701   : > { %2020 = vadd.xlane.f32.xlu2 %v2019_v54 }
 0x703   : > { %v2677_v14 = vpop.permute.xlu1 %2676 }
 0x704   : > { %v2678_v60 = vunpack.i.l.bf16 %v2677_v14  ;;  %v2679_v20 = vunpack.i.h.bf16 %v2677_v14 }
 0x706   : > { %1082 = vmatpush.msrb.mxu2 %v2678_v60 }
 0x708   : > { %1083 = vmatpush.msrb.mxu2 %v2679_v20 }
 0x709   : > { %2460 = vmatmul.msk.f32.vlgmr.msrb.gmra.mxu2 %vm593_vm2, %v1046_v42 }
 0x70a   : > { %1243 = vmatpush.msra.mxu2 %v1206_v2 }
 0x719   : > { %2686 = vrot.lane.b32.xlu2 %v3491_v32, %s2999_s10 }
 0x72e   : > { %v1019_v29 = vpop.xlane.xlu1 %1018 }
 0x72f   : > { %2799 = vrcp.f32 %v1019_v29 }
 0x732   : > { %v1991_v25 = vpop.xlane.xlu0 %1990 }
 0x733   : > { %v2001_v17 = vsub.f32 %v1969_v58, %v1991_v25  ;;  %v1205_v58 = vld [vmem:[#allocation7 + $0x30] sm:$0xff] }
 0x734   : > { %1244 = vmatpush.msra.mxu2 %v1205_v58 }
 0x735   : > { %v2800_v12 = vpop.eup %2799  ;;  %v2015_v31 = vmul.f32 1.442695, %v2001_v17 }
 0x736   : > { %v1047_v3 = vmul.f32 %v2800_v12, %v3736_v23  ;;  %v1204_v23 = vld [vmem:[#allocation7 + $0x28] sm:$0xff] }
 0x737   : > { %2801 = vpow2.f32 %v2015_v31  ;;  %1245 = vmatpush.msra.mxu2 %v1204_v23 }
 0x738   : > { %2461 = vmatmul.msk.f32.gmra.mxu2 %vm593_vm2, %v1047_v3 }
 0x739   : > { %1246 = vmatpush.msra.mxu2 %v1203_v7 }
 0x73d   : > { %v3795_v61 = vpop.eup %2801 }
 0x73e   : > { %v2037_v52 = vsel %vm593_vm2, %v3795_v61, 0.0  ;;  %v2024_v45 = vpop.xlane.xlu1 %2023 }
 0x73f   : > { %2038 = vadd.xlane.f32.xlu1 %v2037_v52 }
 0x758   : > { %2691 = vrot.lane.b32.xlu1 %v3341_v36, %s2999_s10 }
 0x762   : > { %v1985_v32 = vpop.xlane.xlu0 %1984 }
 0x763   : > { %v1999_v16 = vsub.f32 %v1967_v15, %v1985_v32 }
 0x764   : > { %v1979_v39 = vpop.xlane.xlu2 %1978 }
 0x765   : > { %v2011_v56 = vmul.f32 1.442695, %v1999_v16 }
 0x767   : > { %2803 = vpow2.f32 %v2011_v56 }
 0x76a   : > { %v1988_v38 = vpop.xlane.xlu0 %1987 }
 0x76b   : > { %v2000_v15 = vsub.f32 %v1968_v27, %v1988_v38  ;;  %v1731_v38 = vld [vmem:[#allocation7 + $0x48] sm:$0xff] }
 0x76c   : > { %v1982_v47 = vpop.xlane.xlu2 %1981 }
 0x76d   : > { %v3801_v50 = vpop.eup %2803  ;;  %v2013_v33 = vmul.f32 1.442695, %v2000_v15 }
 0x76e   : > { %v2031_v36 = vsel %vm593_vm2, %v3801_v50, 0.0 }
 0x76f   : > { %2032 = vadd.xlane.f32.xlu0 %v2031_v36 }
 0x772   : > { %v1994_v5 = vpop.xlane.xlu0 %1993 }
 0x773   : > { %v2002_v4 = vsub.f32 %v1970_v41, %v1994_v5 }
 0x774   : > { %v2021_v24 = vpop.xlane.xlu2 %2020 }
 0x775   : > { %v2017_v46 = vmul.f32 1.442695, %v2002_v4  ;;  %2805 = vrcp.f32 %v2021_v24  ;;  %v2203_v24 = vld [vmem:[#allocation7 + $0x78] sm:$0xff] }
 0x777   : > { %2807 = vpow2.f32 %v2017_v46  ;;  %v2202_v46 = vld [vmem:[#allocation7 + $0x70] sm:$0xff] }
 0x778   : > { %2809 = vpow2.f32 %v2013_v33 }
 0x779   : > { %2811 = vrcp.f32 %v2024_v45 }
 0x77b   : > { %v2806_v37 = vpop.eup %2805 }
 0x77c   : > { %v2687_v54 = vpop.permute.xlu2 %2686  ;;  %v2051_v41 = vmul.f32 %v2806_v37, %v3784_v53  ;;  %v1997_v53 = vsub.f32 %v3769_v48, %v1979_v39  ;;  %v1732_v39 = vld [vmem:[#allocation7 + $0x50] sm:$0xff]  ;;  %v2200_v37 = vld [vmem:[#allocation7 + $0x60] sm:$0xff] }
 0x77d   : > { %v3805_v14 = vpop.eup %2807  ;;  %v2688_v63 = vunpack.i.l.bf16 %v2687_v54  ;;  %v2689_v27 = vunpack.i.h.bf16 %v2687_v54 }
 0x77e   : > { %v3807_v60 = vpop.eup %2809  ;;  %v2040_v20 = vsel %vm593_vm2, %v3805_v14, 0.0  ;;  %v2007_v12 = vmul.f32 1.442695, %v1997_v53 }
 0x77f   : > { %2041 = vadd.xlane.f32.xlu2 %v2040_v20  ;;  %2085 = vmatpush.msra.mxu0 %v2688_v63  ;;  %v2034_v42 = vsel %vm593_vm2, %v3807_v60, 0.0  ;;  %v2812_v29 = vpop.eup %2811 }
 0x780   : > { %v2052_v25 = vmul.f32 %v2812_v29, %v3743_v28  ;;  %2813 = vpow2.f32 %v2007_v12  ;;  %v1998_v28 = vsub.f32 %v3778_v10, %v1982_v47  ;;  %v1733_v10 = vld [vmem:[#allocation7 + $0x58] sm:$0xff] }
 0x781   : > { %2086 = vmatpush.msra.mxu0 %v2689_v27  ;;  %1770 = vmatpush.msrb.mxu2 %v1733_v10 }
 0x782   : > { %2035 = vadd.xlane.f32.xlu1 %v2034_v42  ;;  %2532 = vmatmul.msk.f32.vlgmr.msra.gmra.mxu0 %vm593_vm2, %v2051_v41  ;;  %v2009_v3 = vmul.f32 1.442695, %v1998_v28 }
 0x783   : > { %2681 = vrot.lane.b32.xlu0 %v3398_v44, %s2999_s10  ;;  %1771 = vmatpush.msrb.mxu2 %v1732_v39 }
 0x784   : > { %2815 = vpow2.f32 %v2009_v3 }
 0x785   : > { %1772 = vmatpush.msrb.mxu2 %v1731_v38 }
 0x786   : > { %v3823_v31 = vpop.eup %2813 }
 0x787   : > { %v2025_v44 = vsel %vm593_vm2, %v3823_v31, 0.0 }
 0x78a   : > { %2533 = vmatmul.msk.f32.gmra.mxu0 %vm593_vm2, %v2052_v25  ;;  %v3829_v32 = vpop.eup %2815 }
 0x78c   : > { %v1085_v17 = vpop.f32.mrf.mxu2 }
 0x78d   : > { %2468 = vmatmul.msk.f32.vlgmr.msra.gmra.mxu2 %vm440_vm0, %v1085_v17 }
 0x79b   : > { %2696 = vrot.lane.b32.xlu1 %v3483_v51, %s2999_s10  ;;  %v2028_v51 = vsel %vm593_vm2, %v3829_v32, 0.0 }
 0x7ad   : > { %2026 = vadd.xlane.f32.xlu0 %v2025_v44 }
 0x7b2   : > { %v2039_v48 = vpop.xlane.xlu1 %2038 }
 0x7b3   : > { %2817 = vrcp.f32 %v2039_v48 }
 0x7b9   : > { %v2818_v2 = vpop.eup %2817 }
 0x7ba   : > { %v2057_v23 = vmul.f32 %v2818_v2, %v3795_v61 }
 0x7bb   : > { %v1088_v52 = vpop.f32.mrf.mxu2 }
 0x7bc   : > { %2469 = vmatmul.msk.f32.gmra.mxu2 %vm440_vm0, %v1088_v52 }
 0x7c4   : > { %2470 = vmatmul.msk.f32.gmra.mxu2 %vm440_vm0, %v3645_v59  ;;  %v1730_v59 = vld [vmem:[#allocation7 + $0x40] sm:$0xff] }
 0x7c5   : > { %2029 = vadd.xlane.f32.xlu1 %v2028_v51  ;;  %1773 = vmatpush.msrb.mxu2 %v1730_v59 }
 0x7ca   : > { %v2692_v16 = vpop.permute.xlu1 %2691 }
 0x7cb   : > { %v2693_v58 = vunpack.i.l.bf16 %v2692_v16  ;;  %v2694_v56 = vunpack.i.h.bf16 %v2692_v16 }
 0x7cc   : > { %2471 = vmatmul.msk.f32.gmra.mxu2 %vm440_vm0, %v3649_v13 }
 0x7cd   : > { %2190 = vmatpush.msrb.mxu0 %v2693_v58 }
 0x7cf   : > { %2191 = vmatpush.msrb.mxu0 %v2694_v56 }
 0x7d0   : > { %2538 = vmatmul.msk.f32.vlgmr.msrb.gmra.mxu0 %vm593_vm2, %v2057_v23 }
 0x7d4   : > { %2472 = vmatmul.msk.f32.gmra.mxu2 %vm440_vm0, %v3522_v57 }
 0x7dc   : > { %2473 = vmatmul.msk.f32.gmra.mxu2 %vm440_vm0, %v3524_v1 }
 0x7e2   : > { %v2033_v13 = vpop.xlane.xlu0 %2032 }
 0x7e3   : > { %2819 = vrcp.f32 %v2033_v13 }
 0x7e4   : > { %2474 = vmatmul.msk.f32.gmra.mxu2 %vm440_vm0, %v3502_v34 }
 0x7e9   : > { %v2820_v7 = vpop.eup %2819 }
 0x7ea   : > { %v2055_v34 = vmul.f32 %v2820_v7, %v3801_v50 }
 0x7ec   : > { %2475 = vmatmul.msk.f32.gmra.mxu2 %vm440_vm0, %v3508_v9 }
 0x7f2   : > { %v2042_v61 = vpop.xlane.xlu2 %2041 }
 0x7f3   : > { %2821 = vrcp.f32 %v2042_v61 }
 0x7f4   : > { %2508 = vmatmul.msk.f32.vlgmr.msrb.gmra.mxu2 %vm440_vm0, %v3745_v19 }
 0x7f5   : > { %v2036_v47 = vpop.xlane.xlu1 %2035  ;;  %v2682_v57 = vpop.permute.xlu0 %2681 }
 0x7f6   : > { %v2683_v36 = vunpack.i.l.bf16 %v2682_v57  ;;  %2823 = vrcp.f32 %v2036_v47  ;;  %v2684_v15 = vunpack.i.h.bf16 %v2682_v57 }
 0x7f8   : > { %2155 = vmatpush.msra.mxu3 %v2683_v36 }
 0x7f9   : > { %v2822_v1 = vpop.eup %2821 }
 0x7fa   : > { %v2058_v5 = vmul.f32 %v2822_v1, %v3805_v14  ;;  %2156 = vmatpush.msra.mxu3 %v2684_v15 }
 0x7fb   : > { %2536 = vmatmul.msk.f32.vlgmr.msra.gmra.mxu3 %vm593_vm2, %v2055_v34 }
 0x7fc   : > { %2509 = vmatmul.msk.f32.gmra.mxu2 %vm440_vm0, %v3751_v11  ;;  %2539 = vmatmul.msk.f32.gmra.mxu0 %vm593_vm2, %v2058_v5  ;;  %v2824_v9 = vpop.eup %2823 }
 0x7fd   : > { %v2056_v19 = vmul.f32 %v2824_v9, %v3807_v60  ;;  %2560 = vmatpush.msrb.mxu3 %v2203_v24 }
 0x7ff   : > { %2561 = vmatpush.msrb.mxu3 %v2202_v46  ;;  %v2088_v63 = vpop.f32.mrf.mxu0 }
 0x803   : > { %2537 = vmatmul.msk.f32.gmra.mxu3 %vm593_vm2, %v2056_v19 }
 0x804   : > { %2510 = vmatmul.msk.f32.gmra.mxu2 %vm440_vm0, %v3747_v22  ;;  %v2201_v22 = vld [vmem:[#allocation7 + $0x68] sm:$0xff] }
 0x805   : > { %2562 = vmatpush.msrb.mxu3 %v2201_v22 }
 0x807   : > { %2563 = vmatpush.msrb.mxu3 %v2200_v37  ;;  %v2091_v27 = vpop.f32.mrf.mxu0 }
 0x80c   : > { %2511 = vmatmul.msk.f32.gmra.mxu2 %vm440_vm0, %v3753_v18 }
 0x80d   : > { %v2697_v50 = vpop.permute.xlu1 %2696 }
 0x80e   : > { %v2698_v4 = vunpack.i.l.bf16 %v2697_v50  ;;  %v2699_v33 = vunpack.i.h.bf16 %v2697_v50 }
 0x810   : > { %2120 = vmatpush.msrb.mxu1 %v2698_v4 }
 0x812   : > { %2121 = vmatpush.msrb.mxu1 %v2699_v33 }
 0x814   : > { %2512 = vmatmul.msk.f32.gmra.mxu2 %vm440_vm0, %v3757_v49  ;;  %2240 = vmatpush.msra.mxu1 %v2203_v24 }
 0x816   : > { %2241 = vmatpush.msra.mxu1 %v2202_v46 }
 0x818   : > { %2242 = vmatpush.msra.mxu1 %v2201_v22 }
 0x81a   : > { %2243 = vmatpush.msra.mxu1 %v2200_v37 }
 0x81c   : > { %2513 = vmatmul.msk.f32.gmra.mxu2 %vm440_vm0, %v3761_v35  ;;  %v1248_v35 = vpop.f32.mrf.mxu2 }
 0x81d   : > { %v1314_v16 = vadd.f32 %v3653_v55, %v1248_v35 }
 0x820   : > { %v2027_v11 = vpop.xlane.xlu0 %2026 }
 0x821   : > { %2825 = vrcp.f32 %v2027_v11 }
 0x824   : > { %2514 = vmatmul.msk.f32.gmra.mxu2 %vm440_vm0, %v3755_v30 }
 0x827   : > { %v2826_v18 = vpop.eup %2825 }
 0x828   : > { %v2053_v49 = vmul.f32 %v2826_v18, %v3823_v31 }
 0x82a   : > { %2534 = vmatmul.msk.f32.vlgmr.msrb.gmra.mxu1 %vm593_vm2, %v2053_v49 }
 0x82c   : > { %2515 = vmatmul.msk.f32.gmra.mxu2 %vm440_vm0, %v3759_v0 }
 0x838   : > { %v2030_v45 = vpop.xlane.xlu1 %2029 }
 0x839   : > { %2827 = vrcp.f32 %v2030_v45 }
 0x83f   : > { %v2828_v30 = vpop.eup %2827  ;;  %v1251_v54 = vpop.f32.mrf.mxu2 }
 0x840   : > { %v2054_v14 = vmul.f32 %v2828_v30, %v3829_v32  ;;  %v1317_v56 = vadd.f32 %v3659_v8, %v1251_v54 }
 0x842   : > { %2535 = vmatmul.msk.f32.gmra.mxu1 %vm593_vm2, %v2054_v14 }
 0x847   : > { %v3873_v60 = vpop.f32.mrf.mxu2 }
 0x84a   : > { %2540 = vmatmul.msk.f32.vlgmr.msra.gmra.mxu1 %vm440_vm0, %v2088_v63 }
 0x84d   : > { %v2193_v44 = vpop.f32.mrf.mxu0 }
 0x84f   : > { %v1257_v20 = vpop.f32.mrf.mxu2 }
 0x850   : > { %v1323_v28 = vadd.f32 %v3673_v43, %v1257_v20  ;;  %v2700_v43 = vld [vmem:[%s3944_s3] ss:$0 sm:$0xff] }
 0x852   : > { %2541 = vmatmul.msk.f32.gmra.mxu1 %vm440_vm0, %v2091_v27 }
 0x857   : > { %v1260_v41 = vpop.f32.mrf.mxu2 }
 0x858   : > { %v1326_v61 = vadd.f32 %v3679_v6, %v1260_v41 }
 0x85f   : > { %v1263_v0 = vpop.f32.mrf.mxu2 }
 0x860   : > { %v1329_v15 = vadd.f32 %v3692_v62, %v1263_v0 }
 0x867   : > { %v1266_v42 = vpop.f32.mrf.mxu2 }
 0x868   : > { %v1332_v50 = vadd.f32 %v3697_v21, %v1266_v42  ;;  %v1320_v21 = vadd.f32 %v3665_v40, %v3873_v60 }
 0x86f   : > { %v1269_v29 = vpop.f32.mrf.mxu2 }
 0x870   : > { %v1335_v62 = vadd.f32 %v3699_v26, %v1269_v29 }
 0x877   : > { %v1775_v25 = vpop.f32.mrf.mxu2 }
 0x878   : > { %v1799_v2 = vadd.f32 %v1775_v25, %v1314_v16 }
 0x879   : > { %v2196_v32 = vpop.f32.mrf.mxu0 }
 0x87e   : > { %v2158_v17 = vpop.f32.mrf.mxu3 }
 0x87f   : > { %v1778_v53 = vpop.f32.mrf.mxu2  ;;  %2544 = vmatmul.msk.f32.vlgmr.msrb.gmra.mxu3 %vm440_vm0, %v2158_v17 }
 0x880   : > { %v1800_v23 = vadd.f32 %v1778_v53, %v1317_v56 }
 0x886   : > { %v2161_v12 = vpop.f32.mrf.mxu3 }
 0x887   : > { %v1781_v31 = vpop.f32.mrf.mxu2  ;;  %2545 = vmatmul.msk.f32.gmra.mxu3 %vm440_vm0, %v2161_v12 }
 0x888   : > { %v1801_v37 = vadd.f32 %v1781_v31, %v1320_v21 }
 0x88f   : > { %v1784_v3 = vpop.f32.mrf.mxu2  ;;  %2546 = vmatmul.msk.f32.gmra.mxu3 %vm440_vm0, %v2193_v44 }
 0x890   : > { %v1802_v52 = vadd.f32 %v1784_v3, %v1323_v28 }
 0x897   : > { %2547 = vmatmul.msk.f32.gmra.mxu3 %vm440_vm0, %v2196_v32  ;;  %v1787_v13 = vpop.f32.mrf.mxu2 }
 0x898   : > { %v1803_v47 = vadd.f32 %v1787_v13, %v1326_v61 }
 0x89f   : > { %v1790_v57 = vpop.f32.mrf.mxu2 }
 0x8a0   : > { %v1804_v1 = vadd.f32 %v1790_v57, %v1329_v15 }
 0x8a7   : > { %v2123_v48 = vpop.f32.mrf.mxu1  ;;  %v1793_v9 = vpop.f32.mrf.mxu2 }
 0x8a8   : > { %2542 = vmatmul.msk.f32.gmra.mxu1 %vm440_vm0, %v2123_v48  ;;  %v1805_v4 = vadd.f32 %v1793_v9, %v1332_v50 }
 0x8af   : > { %v1796_v24 = vpop.f32.mrf.mxu2 }
 0x8b0   : > { %v1806_v46 = vadd.f32 %v1796_v24, %v1335_v62 }
 0x8bf   : > { %v2126_v51 = vpop.f32.mrf.mxu1 }
 0x8c0   : > { %2543 = vmatmul.msk.f32.gmra.mxu1 %vm440_vm0, %v2126_v51 }
 0x8c7   : > { %v2245_v58 = vpop.f32.mrf.mxu1 }
 0x8c8   : > { %v2269_v10 = vadd.f32 %v2245_v58, %v1799_v2 }
 0x8ca   : > { %v2281_v39 = vadd.f32 %v2700_v43, %v2269_v10 }
 0x8cc   : > { %2289 = vst [vmem:[%s3891_s7] sm:$0xff] %v2281_v39 }
 0x8cf   : > { %v2248_v38 = vpop.f32.mrf.mxu1 }
 0x8d0   : > { %v2270_v55 = vadd.f32 %v2248_v38, %v1800_v23 }
 0x8d2   : > { %v2282_v59 = vadd.f32 %v2700_v43, %v2270_v55 }
 0x8d4   : > { %2290 = vst [vmem:[%s3891_s7 + $0x8] sm:$0xff] %v2282_v59 }
 0x902   : > { %v2257_v7 = vpop.f32.mrf.mxu3 }
 0x903   : > { %v2273_v8 = vadd.f32 %v2257_v7, %v1803_v47 }
 0x905   : > { %v2285_v36 = vadd.f32 %v2700_v43, %v2273_v8 }
 0x907   : > { %2293 = vst [vmem:[%s3891_s7 + $0x20] sm:$0xff] %v2285_v36 }
 0x90a   : > { %v2260_v34 = vpop.f32.mrf.mxu3 }
 0x90b   : > { %v2274_v5 = vadd.f32 %v2260_v34, %v1804_v1 }
 0x90d   : > { %v2286_v19 = vadd.f32 %v2700_v43, %v2274_v5 }
 0x90f   : > { %2294 = vst [vmem:[%s3891_s7 + $0x28] sm:$0xff] %v2286_v19 }
 0x912   : > { %v2263_v6 = vpop.f32.mrf.mxu3 }
 0x913   : > { %v2275_v33 = vadd.f32 %v2263_v6, %v1805_v4 }
 0x915   : > { %v2287_v11 = vadd.f32 %v2700_v43, %v2275_v33 }
 0x917   : > { %2295 = vst [vmem:[%s3891_s7 + $0x30] sm:$0xff] %v2287_v11 }
 0x91a   : > { %v2266_v22 = vpop.f32.mrf.mxu3 }
 0x91b   : > { %v2276_v18 = vadd.f32 %v2266_v22, %v1806_v46 }
 0x91d   : > { %v2288_v49 = vadd.f32 %v2700_v43, %v2276_v18 }
 0x91f   : > { %2296 = vst [vmem:[%s3891_s7 + $0x38] sm:$0xff] %v2288_v49 }
 0x925   : > { %v2251_v35 = vpop.f32.mrf.mxu1 }
 0x926   : > { %v2271_v45 = vadd.f32 %v2251_v35, %v1801_v37 }
 0x928   : > { %v2283_v30 = vadd.f32 %v2700_v43, %v2271_v45 }
 0x92a   : > { %2291 = vst [vmem:[%s3891_s7 + $0x10] sm:$0xff] %v2283_v30 }
 0x93d   : > { %v2254_v26 = vpop.f32.mrf.mxu1 }
 0x93e   : > { %v2272_v54 = vadd.f32 %v2254_v26, %v1802_v52 }
 0x940   : > { %v2284_v14 = vadd.f32 %v2700_v43, %v2272_v54 }
 0x942   : > { %2292 = vst [vmem:[%s3891_s7 + $0x18] sm:$0xff] %v2284_v14 }
 0x943   : > { %2946 = shalt.err (!%p2943_p10)
}
 0x944   : > { %s3000_s24 = smov 128   ;;  %s3001_s11 = smov 8  }
 0x945   : > { %2574 = dma.vmem_to_hbm [thread:$0]  (%p3099_p5), %s2312_s28, 1024, %s2314_s29, %s2298_s30, %s3000_s24, %s3000_s24, %s3001_s11  }
 0x946 PF: > { %s2328_s6 = sand.u32 1, %s2977_s15   ;;  %p3955_p12 = scmp.ge.s32.totalorder %s2989_s18, 2 }
 0x947   : > { %s2329_s7 = scalar_lea.sflag [#allocation4], %s2328_s6 }
 0x948   : > { %p2588_p13 = pnand %p3955_p12, %p3062_p6 }
 0x94a   : > { %p2589_p0 = pneg %p2588_p13 }
 0x94c   : > { %2972 = dma.done.wait (%p2589_p0), %s2329_s7, 1024  }
 0x94d   : > { %2974 = vsyncadd (%p2589_p0), %s2329_s7, 4294966272  ;;  %p18_p3 = scmp.ge.s32.totalorder %s3086_s12, 4   ;;  %s3956_s15 = smov %s2981_s16 }
 0x94e   : > { %s3957_s16 = smov %s2985_s17  ;;  %s3958_s17 = smov %s3095_s20 }
 0x94f   : > { %s3959_s18 = smov %s3086_s12  ;;  %20 = sbr.rel (!%p18_p3) target bundleno = 6 (0x6), region = 92 }
 0x954   :  { %2335 = vsyncpa [#allocation3], 1 }
 0x955   :  { %2337 = vsyncpa [#allocation3 + $0x1], 1 }
 0x956   :  { %2338 = vsyncpa [#allocation6], 1 }
 0x957   :  { %2339 = vsyncpa [#allocation4], 1 }
 0x958   :  { %2341 = vsyncpa [#allocation4 + $0x1], 1 }

</bundles_post_ra>
